<compile_context>
chip_gen: v7x
topology: tpu7x:2x2x1
jax: 0.10.0
libtpu: 0.0.40
codegen_flags: <defaults>
</compile_context>

<pallas_src>
import numpy as np
import jax
import jax.numpy as jnp
from jax.experimental import pallas as pl
from jax.experimental.pallas import tpu as pltpu


# ----------------------------------------------------------------------------
# Static layer configuration of ConvEncoder4's nn.Sequential
# ----------------------------------------------------------------------------
def _conv_specs(s_dim, n_cin, n_hw):
    """Returns [(cin, cout, k, stride, pad, relu)] for the 11 Conv2d layers."""
    ks = [(4, 2, 1, True), (3, 1, 1, True),
          (4, 2, 1, True), (3, 1, 1, True),
          (4, 2, 1, True), (3, 1, 1, True),
          (4, 2, 1, True), (3, 1, 1, True),
          (n_hw // 16, 1, 0, True),
          (1, 1, 0, True),
          (1, 1, 0, False)]
    specs, cin = [], n_cin
    for (k, s, p, relu) in ks:
        specs.append((cin, s_dim, k, s, p, relu))
        cin = s_dim
    return specs


# ----------------------------------------------------------------------------
# One-time parameter preparation (all weight re-layout hoisted out of forward)
# ----------------------------------------------------------------------------
def prepare_encoder(params, s_dim, n_cin, n_hw, batch):
    """Precompute per-layer (G, M, bias) operands for the fused kernel.

    Returns (layer_meta, flat_operands):
      layer_meta    : static python metadata consumed at trace time
      flat_operands : list of jnp arrays passed to the single pallas_call
    """
    specs = _conv_specs(s_dim, n_cin, n_hw)
    N = batch
    meta, ops = [], []
    H = W = n_hw
    for li, (cin, cout, k, s, p, relu) in enumerate(specs):
        Ho = (H + 2 * p - k) // s + 1
        Wo = (W + 2 * p - k) // s + 1
        w = np.asarray(params[f"w{li}"], np.float32)      # [cout, cin, k, k]
        b = np.asarray(params[f"b{li}"], np.float32)      # [cout]
        has_g = not (k == 1 and s == 1 and p == 0)

        G_list, M_list = [], []
        for di in range(k):
            # vertical taps: block-diagonal per image on sublanes
            G_di = np.zeros((N * Ho, N * H), np.float32)
            for n in range(N):
                for oh in range(Ho):
                    h = s * oh + di - p
                    if 0 <= h < H:
                        G_di[n * Ho + oh, n * H + h] = 1.0
            # horizontal taps + channel mixing (batch-free: batch is on rows)
            M_di = np.zeros((W * cin, Wo * cout), np.float32)
            for ww in range(W):
                for ow in range(Wo):
                    dj = ww - s * ow + p
                    if 0 <= dj < k:
                        M_di[ww * cin:(ww + 1) * cin,
                             ow * cout:(ow + 1) * cout] = w[:, :, di, dj].T
            # prune taps that contribute nothing (e.g. padding-only taps)
            if has_g and not G_di.any():
                continue
            if not M_di.any():
                continue
            G_list.append(G_di)
            M_list.append(M_di)

        taps = len(M_list)
        if has_g:
            ops.append(jnp.asarray(np.stack(G_list)))     # [taps, N*Ho, N*H]
        ops.append(jnp.asarray(np.stack(M_list)))         # [taps, W*cin, Wo*cout]
        ops.append(jnp.asarray(np.tile(b, Wo)[None, :]))  # [1, Wo*cout]
        meta.append(dict(has_g=has_g, taps=taps, relu=relu))
        H, W = Ho, Wo

    # merged Linear heads as a final "1x1" layer:  [N, s_dim] -> [N, 2*s_dim]
    wm = np.asarray(params["wm"], np.float32)             # [s_dim, s_dim]
    wv = np.asarray(params["wv"], np.float32)
    bm = np.asarray(params["bm"], np.float32)
    bv = np.asarray(params["bv"], np.float32)
    Mh = np.concatenate([wm.T, wv.T], axis=1)[None]       # [1, s_dim, 2*s_dim]
    ops.append(jnp.asarray(Mh))
    ops.append(jnp.asarray(np.concatenate([bm, bv])[None, :]))
    meta.append(dict(has_g=False, taps=1, relu=False))
    return meta, ops


# ----------------------------------------------------------------------------
# The single fused Pallas kernel
# ----------------------------------------------------------------------------
def _make_kernel(layer_meta):
    def kernel(*refs):
        x_ref = refs[0]
        out_ref = refs[-1]
        prm = refs[1:-1]
        x = x_ref[...]                                    # [N*H, W*Cin], f32
        i = 0
        for m in layer_meta:
            if m["has_g"]:
                g_ref = prm[i]
                i += 1
            m_ref = prm[i]
            b_ref = prm[i + 1]
            i += 2
            acc = b_ref[...]                              # [1, Wo*Cout] broadcasts
            for t in range(m["taps"]):                    # static unroll
                if m["has_g"]:
                    lhs = jnp.dot(g_ref[t], x,
                                  preferred_element_type=jnp.float32)
                else:
                    lhs = x
                acc = acc + jnp.dot(lhs, m_ref[t],
                                    preferred_element_type=jnp.float32)
            x = jnp.maximum(acc, 0.0) if m["relu"] else acc
        out_ref[...] = x                                  # [N, 2*s_dim]
    return kernel


def conv_encoder4_forward(layer_meta, ops, x_nchw, *, s_dim):
    N, C, H, W = x_nchw.shape
    # pack NCHW -> [N*H, W*C]  (batch/row on sublanes; width/channel on lanes)
    x_packed = jnp.transpose(x_nchw.astype(jnp.float32),
                             (0, 2, 3, 1)).reshape(N * H, W * C)
    out = pl.pallas_call(
        _make_kernel(layer_meta),
        out_shape=jax.ShapeDtypeStruct((N, 2 * s_dim), jnp.float32),
        compiler_params=pltpu.CompilerParams(
            vmem_limit_bytes=32 * 1024 * 1024),
    )(x_packed, *ops)                                     # everything in VMEM
    return out[:, :s_dim], out[:, s_dim:]


# ----------------------------------------------------------------------------
# Deterministic parameter init (matches nn.Module parameter shapes)
# ----------------------------------------------------------------------------
def init_params(key, s_dim, n_cin, n_hw):
    specs = _conv_specs(s_dim, n_cin, n_hw)
    ks = jax.random.split(key, 2 * len(specs) + 4)
    params, i = {}, 0
    for li, (cin, cout, k, s, p, relu) in enumerate(specs):
        std = (2.0 / (cin * k * k)) ** 0.5
        params[f"w{li}"] = jax.random.normal(ks[i], (cout, cin, k, k),
                                             jnp.float32) * std
        params[f"b{li}"] = jax.random.normal(ks[i + 1], (cout,),
                                             jnp.float32) * 0.1
        i += 2
    hs = (1.0 / s_dim) ** 0.5
    params["wm"] = jax.random.normal(ks[i], (s_dim, s_dim), jnp.float32) * hs
    params["bm"] = jax.random.normal(ks[i + 1], (s_dim,), jnp.float32) * 0.1
    params["wv"] = jax.random.normal(ks[i + 2], (s_dim, s_dim), jnp.float32) * hs
    params["bv"] = jax.random.normal(ks[i + 3], (s_dim,), jnp.float32) * 0.1
    return params


# Pure-JAX reference (XLA conv, HIGHEST precision) for the correctness check.
def _ref_forward(params, x_nchw, s_dim, n_cin, n_hw):
    specs = _conv_specs(s_dim, n_cin, n_hw)
    y = x_nchw.astype(jnp.float32)
    for li, (cin, cout, k, s, p, relu) in enumerate(specs):
        y = jax.lax.conv_general_dilated(
            y, params[f"w{li}"], window_strides=(s, s),
            padding=[(p, p), (p, p)],
            dimension_numbers=("NCHW", "OIHW", "NCHW"),
            precision=jax.lax.Precision.HIGHEST)
        y = y + params[f"b{li}"][None, :, None, None]
        if relu:
            y = jnp.maximum(y, 0.0)
    feat = y.reshape(-1, s_dim)
    means = jnp.dot(feat, params["wm"].T,
                    precision=jax.lax.Precision.HIGHEST) + params["bm"]
    log_vars = jnp.dot(feat, params["wv"].T,
                       precision=jax.lax.Precision.HIGHEST) + params["bv"]
    return means, log_vars


if __name__ == "__main__":
    s_dim, n_cin, n_hw, batch = 8, 4, 16, 2   # n_hw must be a multiple of 16

    key = jax.random.PRNGKey(0)
    kx, kp = jax.random.split(key)
    x = jax.random.normal(kx, (batch, n_cin, n_hw, n_hw), jnp.float32)  # NCHW
    params = init_params(kp, s_dim, n_cin, n_hw)

    # one-time weight re-layout (hoisted out of the forward)
    layer_meta, ops = prepare_encoder(params, s_dim, n_cin, n_hw, batch)

    @jax.jit
    def forward(ops, x):
        return conv_encoder4_forward(layer_meta, ops, x, s_dim=s_dim)

    means, log_vars = jax.block_until_ready(forward(ops, x))

    ref_means, ref_log_vars = _ref_forward(params, x, s_dim, n_cin, n_hw)
    assert means.shape == (batch, s_dim) and log_vars.shape == (batch, s_dim)
    # loose-ish tolerance: MXU f32 matmul passes vs. HIGHEST-precision XLA conv
    assert jnp.allclose(means, ref_means, atol=5e-2, rtol=5e-2), (
        float(jnp.max(jnp.abs(means - ref_means))))
    assert jnp.allclose(log_vars, ref_log_vars, atol=5e-2, rtol=5e-2), (
        float(jnp.max(jnp.abs(log_vars - ref_log_vars))))

    print("KERNEL_OK")
</pallas_src>

<mosaic_0001>
module attributes {stable_mosaic.version = 11 : i64} {
  func.func @kernel(%arg0: memref<32x64xf32, #tpu.memory_space<vmem>>, %arg1: memref<4x16x32xf32, #tpu.memory_space<vmem>>, %arg2: memref<4x64x64xf32, #tpu.memory_space<vmem>>, %arg3: memref<1x64xf32, #tpu.memory_space<vmem>>, %arg4: memref<3x16x16xf32, #tpu.memory_space<vmem>>, %arg5: memref<3x64x64xf32, #tpu.memory_space<vmem>>, %arg6: memref<1x64xf32, #tpu.memory_space<vmem>>, %arg7: memref<4x8x16xf32, #tpu.memory_space<vmem>>, %arg8: memref<4x64x32xf32, #tpu.memory_space<vmem>>, %arg9: memref<1x32xf32, #tpu.memory_space<vmem>>, %arg10: memref<3x8x8xf32, #tpu.memory_space<vmem>>, %arg11: memref<3x32x32xf32, #tpu.memory_space<vmem>>, %arg12: memref<1x32xf32, #tpu.memory_space<vmem>>, %arg13: memref<4x4x8xf32, #tpu.memory_space<vmem>>, %arg14: memref<4x32x16xf32, #tpu.memory_space<vmem>>, %arg15: memref<1x16xf32, #tpu.memory_space<vmem>>, %arg16: memref<3x4x4xf32, #tpu.memory_space<vmem>>, %arg17: memref<3x16x16xf32, #tpu.memory_space<vmem>>, %arg18: memref<1x16xf32, #tpu.memory_space<vmem>>, %arg19: memref<2x2x4xf32, #tpu.memory_space<vmem>>, %arg20: memref<2x16x8xf32, #tpu.memory_space<vmem>>, %arg21: memref<1x8xf32, #tpu.memory_space<vmem>>, %arg22: memref<1x2x2xf32, #tpu.memory_space<vmem>>, %arg23: memref<1x8x8xf32, #tpu.memory_space<vmem>>, %arg24: memref<1x8xf32, #tpu.memory_space<vmem>>, %arg25: memref<1x8x8xf32, #tpu.memory_space<vmem>>, %arg26: memref<1x8xf32, #tpu.memory_space<vmem>>, %arg27: memref<1x8x8xf32, #tpu.memory_space<vmem>>, %arg28: memref<1x8xf32, #tpu.memory_space<vmem>>, %arg29: memref<1x8x8xf32, #tpu.memory_space<vmem>>, %arg30: memref<1x8xf32, #tpu.memory_space<vmem>>, %arg31: memref<1x8x16xf32, #tpu.memory_space<vmem>>, %arg32: memref<1x16xf32, #tpu.memory_space<vmem>>, %arg33: memref<2x16xf32, #tpu.memory_space<vmem>>) attributes {dimension_semantics = [], scalar_prefetch = 0 : i64, scratch_operands = 0 : i64, tpu.core_type = #tpu.core_type<tc>} {
    %c0 = arith.constant 0 : index
    %c0_0 = arith.constant 0 : index
    %0 = vector.load %arg0[%c0, %c0_0] : memref<32x64xf32, #tpu.memory_space<vmem>>, vector<32x64xf32>
    %c0_1 = arith.constant 0 : index
    %c0_2 = arith.constant 0 : index
    %1 = vector.load %arg3[%c0_1, %c0_2] : memref<1x64xf32, #tpu.memory_space<vmem>>, vector<1x64xf32>
    %c0_3 = arith.constant 0 : index
    %c0_4 = arith.constant 0 : index
    %c0_5 = arith.constant 0 : index
    %2 = vector.load %arg1[%c0_3, %c0_4, %c0_5] : memref<4x16x32xf32, #tpu.memory_space<vmem>>, vector<1x16x32xf32>
    %3 = vector.shape_cast %2 : vector<1x16x32xf32> to vector<16x32xf32>
    %cst = arith.constant dense<0.000000e+00> : vector<16x64xf32>
    %4 = tpu.matmul %3, %0, %cst {dimension_numbers = #tpu.dot_dimension_numbers<[1], [0], [0], [1], [0, 0, 1, 1], [], []>} : vector<16x32xf32>, vector<32x64xf32>, vector<16x64xf32> -> vector<16x64xf32>
    %c0_6 = arith.constant 0 : index
    %c0_7 = arith.constant 0 : index
    %c0_8 = arith.constant 0 : index
    %5 = vector.load %arg2[%c0_6, %c0_7, %c0_8] : memref<4x64x64xf32, #tpu.memory_space<vmem>>, vector<1x64x64xf32>
    %6 = vector.shape_cast %5 : vector<1x64x64xf32> to vector<64x64xf32>
    %cst_9 = arith.constant dense<0.000000e+00> : vector<16x64xf32>
    %7 = tpu.matmul %4, %6, %cst_9 {dimension_numbers = #tpu.dot_dimension_numbers<[1], [0], [0], [1], [0, 0, 1, 1], [], []>} : vector<16x64xf32>, vector<64x64xf32>, vector<16x64xf32> -> vector<16x64xf32>
    %8 = vector.broadcast %1 : vector<1x64xf32> to vector<16x64xf32>
    %9 = arith.addf %8, %7 : vector<16x64xf32>
    %c1 = arith.constant 1 : index
    %c0_10 = arith.constant 0 : index
    %c0_11 = arith.constant 0 : index
    %10 = vector.load %arg1[%c1, %c0_10, %c0_11] : memref<4x16x32xf32, #tpu.memory_space<vmem>>, vector<1x16x32xf32>
    %11 = vector.shape_cast %10 : vector<1x16x32xf32> to vector<16x32xf32>
    %cst_12 = arith.constant dense<0.000000e+00> : vector<16x64xf32>
    %12 = tpu.matmul %11, %0, %cst_12 {dimension_numbers = #tpu.dot_dimension_numbers<[1], [0], [0], [1], [0, 0, 1, 1], [], []>} : vector<16x32xf32>, vector<32x64xf32>, vector<16x64xf32> -> vector<16x64xf32>
    %c1_13 = arith.constant 1 : index
    %c0_14 = arith.constant 0 : index
    %c0_15 = arith.constant 0 : index
    %13 = vector.load %arg2[%c1_13, %c0_14, %c0_15] : memref<4x64x64xf32, #tpu.memory_space<vmem>>, vector<1x64x64xf32>
    %14 = vector.shape_cast %13 : vector<1x64x64xf32> to vector<64x64xf32>
    %cst_16 = arith.constant dense<0.000000e+00> : vector<16x64xf32>
    %15 = tpu.matmul %12, %14, %cst_16 {dimension_numbers = #tpu.dot_dimension_numbers<[1], [0], [0], [1], [0, 0, 1, 1], [], []>} : vector<16x64xf32>, vector<64x64xf32>, vector<16x64xf32> -> vector<16x64xf32>
    %16 = arith.addf %9, %15 : vector<16x64xf32>
    %c2 = arith.constant 2 : index
    %c0_17 = arith.constant 0 : index
    %c0_18 = arith.constant 0 : index
    %17 = vector.load %arg1[%c2, %c0_17, %c0_18] : memref<4x16x32xf32, #tpu.memory_space<vmem>>, vector<1x16x32xf32>
    %18 = vector.shape_cast %17 : vector<1x16x32xf32> to vector<16x32xf32>
    %cst_19 = arith.constant dense<0.000000e+00> : vector<16x64xf32>
    %19 = tpu.matmul %18, %0, %cst_19 {dimension_numbers = #tpu.dot_dimension_numbers<[1], [0], [0], [1], [0, 0, 1, 1], [], []>} : vector<16x32xf32>, vector<32x64xf32>, vector<16x64xf32> -> vector<16x64xf32>
    %c2_20 = arith.constant 2 : index
    %c0_21 = arith.constant 0 : index
    %c0_22 = arith.constant 0 : index
    %20 = vector.load %arg2[%c2_20, %c0_21, %c0_22] : memref<4x64x64xf32, #tpu.memory_space<vmem>>, vector<1x64x64xf32>
    %21 = vector.shape_cast %20 : vector<1x64x64xf32> to vector<64x64xf32>
    %cst_23 = arith.constant dense<0.000000e+00> : vector<16x64xf32>
    %22 = tpu.matmul %19, %21, %cst_23 {dimension_numbers = #tpu.dot_dimension_numbers<[1], [0], [0], [1], [0, 0, 1, 1], [], []>} : vector<16x64xf32>, vector<64x64xf32>, vector<16x64xf32> -> vector<16x64xf32>
    %23 = arith.addf %16, %22 : vector<16x64xf32>
    %c3 = arith.constant 3 : index
    %c0_24 = arith.constant 0 : index
    %c0_25 = arith.constant 0 : index
    %24 = vector.load %arg1[%c3, %c0_24, %c0_25] : memref<4x16x32xf32, #tpu.memory_space<vmem>>, vector<1x16x32xf32>
    %25 = vector.shape_cast %24 : vector<1x16x32xf32> to vector<16x32xf32>
    %cst_26 = arith.constant dense<0.000000e+00> : vector<16x64xf32>
    %26 = tpu.matmul %25, %0, %cst_26 {dimension_numbers = #tpu.dot_dimension_numbers<[1], [0], [0], [1], [0, 0, 1, 1], [], []>} : vector<16x32xf32>, vector<32x64xf32>, vector<16x64xf32> -> vector<16x64xf32>
    %c3_27 = arith.constant 3 : index
    %c0_28 = arith.constant 0 : index
    %c0_29 = arith.constant 0 : index
    %27 = vector.load %arg2[%c3_27, %c0_28, %c0_29] : memref<4x64x64xf32, #tpu.memory_space<vmem>>, vector<1x64x64xf32>
    %28 = vector.shape_cast %27 : vector<1x64x64xf32> to vector<64x64xf32>
    %cst_30 = arith.constant dense<0.000000e+00> : vector<16x64xf32>
    %29 = tpu.matmul %26, %28, %cst_30 {dimension_numbers = #tpu.dot_dimension_numbers<[1], [0], [0], [1], [0, 0, 1, 1], [], []>} : vector<16x64xf32>, vector<64x64xf32>, vector<16x64xf32> -> vector<16x64xf32>
    %30 = arith.addf %23, %29 : vector<16x64xf32>
    %cst_31 = arith.constant 0.000000e+00 : f32
    %31 = vector.broadcast %cst_31 : f32 to vector<16x64xf32>
    %32 = arith.maximumf %30, %31 : vector<16x64xf32>
    %c0_32 = arith.constant 0 : index
    %c0_33 = arith.constant 0 : index
    %33 = vector.load %arg6[%c0_32, %c0_33] : memref<1x64xf32, #tpu.memory_space<vmem>>, vector<1x64xf32>
    %c0_34 = arith.constant 0 : index
    %c0_35 = arith.constant 0 : index
    %c0_36 = arith.constant 0 : index
    %34 = vector.load %arg4[%c0_34, %c0_35, %c0_36] : memref<3x16x16xf32, #tpu.memory_space<vmem>>, vector<1x16x16xf32>
    %35 = vector.shape_cast %34 : vector<1x16x16xf32> to vector<16x16xf32>
    %cst_37 = arith.constant dense<0.000000e+00> : vector<16x64xf32>
    %36 = tpu.matmul %35, %32, %cst_37 {dimension_numbers = #tpu.dot_dimension_numbers<[1], [0], [0], [1], [0, 0, 1, 1], [], []>} : vector<16x16xf32>, vector<16x64xf32>, vector<16x64xf32> -> vector<16x64xf32>
    %c0_38 = arith.constant 0 : index
    %c0_39 = arith.constant 0 : index
    %c0_40 = arith.constant 0 : index
    %37 = vector.load %arg5[%c0_38, %c0_39, %c0_40] : memref<3x64x64xf32, #tpu.memory_space<vmem>>, vector<1x64x64xf32>
    %38 = vector.shape_cast %37 : vector<1x64x64xf32> to vector<64x64xf32>
    %cst_41 = arith.constant dense<0.000000e+00> : vector<16x64xf32>
    %39 = tpu.matmul %36, %38, %cst_41 {dimension_numbers = #tpu.dot_dimension_numbers<[1], [0], [0], [1], [0, 0, 1, 1], [], []>} : vector<16x64xf32>, vector<64x64xf32>, vector<16x64xf32> -> vector<16x64xf32>
    %40 = vector.broadcast %33 : vector<1x64xf32> to vector<16x64xf32>
    %41 = arith.addf %40, %39 : vector<16x64xf32>
    %c1_42 = arith.constant 1 : index
    %c0_43 = arith.constant 0 : index
    %c0_44 = arith.constant 0 : index
    %42 = vector.load %arg4[%c1_42, %c0_43, %c0_44] : memref<3x16x16xf32, #tpu.memory_space<vmem>>, vector<1x16x16xf32>
    %43 = vector.shape_cast %42 : vector<1x16x16xf32> to vector<16x16xf32>
    %cst_45 = arith.constant dense<0.000000e+00> : vector<16x64xf32>
    %44 = tpu.matmul %43, %32, %cst_45 {dimension_numbers = #tpu.dot_dimension_numbers<[1], [0], [0], [1], [0, 0, 1, 1], [], []>} : vector<16x16xf32>, vector<16x64xf32>, vector<16x64xf32> -> vector<16x64xf32>
    %c1_46 = arith.constant 1 : index
    %c0_47 = arith.constant 0 : index
    %c0_48 = arith.constant 0 : index
    %45 = vector.load %arg5[%c1_46, %c0_47, %c0_48] : memref<3x64x64xf32, #tpu.memory_space<vmem>>, vector<1x64x64xf32>
    %46 = vector.shape_cast %45 : vector<1x64x64xf32> to vector<64x64xf32>
    %cst_49 = arith.constant dense<0.000000e+00> : vector<16x64xf32>
    %47 = tpu.matmul %44, %46, %cst_49 {dimension_numbers = #tpu.dot_dimension_numbers<[1], [0], [0], [1], [0, 0, 1, 1], [], []>} : vector<16x64xf32>, vector<64x64xf32>, vector<16x64xf32> -> vector<16x64xf32>
    %48 = arith.addf %41, %47 : vector<16x64xf32>
    %c2_50 = arith.constant 2 : index
    %c0_51 = arith.constant 0 : index
    %c0_52 = arith.constant 0 : index
    %49 = vector.load %arg4[%c2_50, %c0_51, %c0_52] : memref<3x16x16xf32, #tpu.memory_space<vmem>>, vector<1x16x16xf32>
    %50 = vector.shape_cast %49 : vector<1x16x16xf32> to vector<16x16xf32>
    %cst_53 = arith.constant dense<0.000000e+00> : vector<16x64xf32>
    %51 = tpu.matmul %50, %32, %cst_53 {dimension_numbers = #tpu.dot_dimension_numbers<[1], [0], [0], [1], [0, 0, 1, 1], [], []>} : vector<16x16xf32>, vector<16x64xf32>, vector<16x64xf32> -> vector<16x64xf32>
    %c2_54 = arith.constant 2 : index
    %c0_55 = arith.constant 0 : index
    %c0_56 = arith.constant 0 : index
    %52 = vector.load %arg5[%c2_54, %c0_55, %c0_56] : memref<3x64x64xf32, #tpu.memory_space<vmem>>, vector<1x64x64xf32>
    %53 = vector.shape_cast %52 : vector<1x64x64xf32> to vector<64x64xf32>
    %cst_57 = arith.constant dense<0.000000e+00> : vector<16x64xf32>
    %54 = tpu.matmul %51, %53, %cst_57 {dimension_numbers = #tpu.dot_dimension_numbers<[1], [0], [0], [1], [0, 0, 1, 1], [], []>} : vector<16x64xf32>, vector<64x64xf32>, vector<16x64xf32> -> vector<16x64xf32>
    %55 = arith.addf %48, %54 : vector<16x64xf32>
    %cst_58 = arith.constant 0.000000e+00 : f32
    %56 = vector.broadcast %cst_58 : f32 to vector<16x64xf32>
    %57 = arith.maximumf %55, %56 : vector<16x64xf32>
    %c0_59 = arith.constant 0 : index
    %c0_60 = arith.constant 0 : index
    %58 = vector.load %arg9[%c0_59, %c0_60] : memref<1x32xf32, #tpu.memory_space<vmem>>, vector<1x32xf32>
    %c0_61 = arith.constant 0 : index
    %c0_62 = arith.constant 0 : index
    %c0_63 = arith.constant 0 : index
    %59 = vector.load %arg7[%c0_61, %c0_62, %c0_63] : memref<4x8x16xf32, #tpu.memory_space<vmem>>, vector<1x8x16xf32>
    %60 = vector.shape_cast %59 : vector<1x8x16xf32> to vector<8x16xf32>
    %cst_64 = arith.constant dense<0.000000e+00> : vector<8x64xf32>
    %61 = tpu.matmul %60, %57, %cst_64 {dimension_numbers = #tpu.dot_dimension_numbers<[1], [0], [0], [1], [0, 0, 1, 1], [], []>} : vector<8x16xf32>, vector<16x64xf32>, vector<8x64xf32> -> vector<8x64xf32>
    %c0_65 = arith.constant 0 : index
    %c0_66 = arith.constant 0 : index
    %c0_67 = arith.constant 0 : index
    %62 = vector.load %arg8[%c0_65, %c0_66, %c0_67] : memref<4x64x32xf32, #tpu.memory_space<vmem>>, vector<1x64x32xf32>
    %63 = vector.shape_cast %62 : vector<1x64x32xf32> to vector<64x32xf32>
    %cst_68 = arith.constant dense<0.000000e+00> : vector<8x32xf32>
    %64 = tpu.matmul %61, %63, %cst_68 {dimension_numbers = #tpu.dot_dimension_numbers<[1], [0], [0], [1], [0, 0, 1, 1], [], []>} : vector<8x64xf32>, vector<64x32xf32>, vector<8x32xf32> -> vector<8x32xf32>
    %65 = vector.broadcast %58 : vector<1x32xf32> to vector<8x32xf32>
    %66 = arith.addf %65, %64 : vector<8x32xf32>
    %c1_69 = arith.constant 1 : index
    %c0_70 = arith.constant 0 : index
    %c0_71 = arith.constant 0 : index
    %67 = vector.load %arg7[%c1_69, %c0_70, %c0_71] : memref<4x8x16xf32, #tpu.memory_space<vmem>>, vector<1x8x16xf32>
    %68 = vector.shape_cast %67 : vector<1x8x16xf32> to vector<8x16xf32>
    %cst_72 = arith.constant dense<0.000000e+00> : vector<8x64xf32>
    %69 = tpu.matmul %68, %57, %cst_72 {dimension_numbers = #tpu.dot_dimension_numbers<[1], [0], [0], [1], [0, 0, 1, 1], [], []>} : vector<8x16xf32>, vector<16x64xf32>, vector<8x64xf32> -> vector<8x64xf32>
    %c1_73 = arith.constant 1 : index
    %c0_74 = arith.constant 0 : index
    %c0_75 = arith.constant 0 : index
    %70 = vector.load %arg8[%c1_73, %c0_74, %c0_75] : memref<4x64x32xf32, #tpu.memory_space<vmem>>, vector<1x64x32xf32>
    %71 = vector.shape_cast %70 : vector<1x64x32xf32> to vector<64x32xf32>
    %cst_76 = arith.constant dense<0.000000e+00> : vector<8x32xf32>
    %72 = tpu.matmul %69, %71, %cst_76 {dimension_numbers = #tpu.dot_dimension_numbers<[1], [0], [0], [1], [0, 0, 1, 1], [], []>} : vector<8x64xf32>, vector<64x32xf32>, vector<8x32xf32> -> vector<8x32xf32>
    %73 = arith.addf %66, %72 : vector<8x32xf32>
    %c2_77 = arith.constant 2 : index
    %c0_78 = arith.constant 0 : index
    %c0_79 = arith.constant 0 : index
    %74 = vector.load %arg7[%c2_77, %c0_78, %c0_79] : memref<4x8x16xf32, #tpu.memory_space<vmem>>, vector<1x8x16xf32>
    %75 = vector.shape_cast %74 : vector<1x8x16xf32> to vector<8x16xf32>
    %cst_80 = arith.constant dense<0.000000e+00> : vector<8x64xf32>
    %76 = tpu.matmul %75, %57, %cst_80 {dimension_numbers = #tpu.dot_dimension_numbers<[1], [0], [0], [1], [0, 0, 1, 1], [], []>} : vector<8x16xf32>, vector<16x64xf32>, vector<8x64xf32> -> vector<8x64xf32>
    %c2_81 = arith.constant 2 : index
    %c0_82 = arith.constant 0 : index
    %c0_83 = arith.constant 0 : index
    %77 = vector.load %arg8[%c2_81, %c0_82, %c0_83] : memref<4x64x32xf32, #tpu.memory_space<vmem>>, vector<1x64x32xf32>
    %78 = vector.shape_cast %77 : vector<1x64x32xf32> to vector<64x32xf32>
    %cst_84 = arith.constant dense<0.000000e+00> : vector<8x32xf32>
    %79 = tpu.matmul %76, %78, %cst_84 {dimension_numbers = #tpu.dot_dimension_numbers<[1], [0], [0], [1], [0, 0, 1, 1], [], []>} : vector<8x64xf32>, vector<64x32xf32>, vector<8x32xf32> -> vector<8x32xf32>
    %80 = arith.addf %73, %79 : vector<8x32xf32>
    %c3_85 = arith.constant 3 : index
    %c0_86 = arith.constant 0 : index
    %c0_87 = arith.constant 0 : index
    %81 = vector.load %arg7[%c3_85, %c0_86, %c0_87] : memref<4x8x16xf32, #tpu.memory_space<vmem>>, vector<1x8x16xf32>
    %82 = vector.shape_cast %81 : vector<1x8x16xf32> to vector<8x16xf32>
    %cst_88 = arith.constant dense<0.000000e+00> : vector<8x64xf32>
    %83 = tpu.matmul %82, %57, %cst_88 {dimension_numbers = #tpu.dot_dimension_numbers<[1], [0], [0], [1], [0, 0, 1, 1], [], []>} : vector<8x16xf32>, vector<16x64xf32>, vector<8x64xf32> -> vector<8x64xf32>
    %c3_89 = arith.constant 3 : index
    %c0_90 = arith.constant 0 : index
    %c0_91 = arith.constant 0 : index
    %84 = vector.load %arg8[%c3_89, %c0_90, %c0_91] : memref<4x64x32xf32, #tpu.memory_space<vmem>>, vector<1x64x32xf32>
    %85 = vector.shape_cast %84 : vector<1x64x32xf32> to vector<64x32xf32>
    %cst_92 = arith.constant dense<0.000000e+00> : vector<8x32xf32>
    %86 = tpu.matmul %83, %85, %cst_92 {dimension_numbers = #tpu.dot_dimension_numbers<[1], [0], [0], [1], [0, 0, 1, 1], [], []>} : vector<8x64xf32>, vector<64x32xf32>, vector<8x32xf32> -> vector<8x32xf32>
    %87 = arith.addf %80, %86 : vector<8x32xf32>
    %cst_93 = arith.constant 0.000000e+00 : f32
    %88 = vector.broadcast %cst_93 : f32 to vector<8x32xf32>
    %89 = arith.maximumf %87, %88 : vector<8x32xf32>
    %c0_94 = arith.constant 0 : index
    %c0_95 = arith.constant 0 : index
    %90 = vector.load %arg12[%c0_94, %c0_95] : memref<1x32xf32, #tpu.memory_space<vmem>>, vector<1x32xf32>
    %c0_96 = arith.constant 0 : index
    %c0_97 = arith.constant 0 : index
    %c0_98 = arith.constant 0 : index
    %91 = vector.load %arg10[%c0_96, %c0_97, %c0_98] : memref<3x8x8xf32, #tpu.memory_space<vmem>>, vector<1x8x8xf32>
    %92 = vector.shape_cast %91 : vector<1x8x8xf32> to vector<8x8xf32>
    %cst_99 = arith.constant dense<0.000000e+00> : vector<8x32xf32>
    %93 = tpu.matmul %92, %89, %cst_99 {dimension_numbers = #tpu.dot_dimension_numbers<[1], [0], [0], [1], [0, 0, 1, 1], [], []>} : vector<8x8xf32>, vector<8x32xf32>, vector<8x32xf32> -> vector<8x32xf32>
    %c0_100 = arith.constant 0 : index
    %c0_101 = arith.constant 0 : index
    %c0_102 = arith.constant 0 : index
    %94 = vector.load %arg11[%c0_100, %c0_101, %c0_102] : memref<3x32x32xf32, #tpu.memory_space<vmem>>, vector<1x32x32xf32>
    %95 = vector.shape_cast %94 : vector<1x32x32xf32> to vector<32x32xf32>
    %cst_103 = arith.constant dense<0.000000e+00> : vector<8x32xf32>
    %96 = tpu.matmul %93, %95, %cst_103 {dimension_numbers = #tpu.dot_dimension_numbers<[1], [0], [0], [1], [0, 0, 1, 1], [], []>} : vector<8x32xf32>, vector<32x32xf32>, vector<8x32xf32> -> vector<8x32xf32>
    %97 = vector.broadcast %90 : vector<1x32xf32> to vector<8x32xf32>
    %98 = arith.addf %97, %96 : vector<8x32xf32>
    %c1_104 = arith.constant 1 : index
    %c0_105 = arith.constant 0 : index
    %c0_106 = arith.constant 0 : index
    %99 = vector.load %arg10[%c1_104, %c0_105, %c0_106] : memref<3x8x8xf32, #tpu.memory_space<vmem>>, vector<1x8x8xf32>
    %100 = vector.shape_cast %99 : vector<1x8x8xf32> to vector<8x8xf32>
    %cst_107 = arith.constant dense<0.000000e+00> : vector<8x32xf32>
    %101 = tpu.matmul %100, %89, %cst_107 {dimension_numbers = #tpu.dot_dimension_numbers<[1], [0], [0], [1], [0, 0, 1, 1], [], []>} : vector<8x8xf32>, vector<8x32xf32>, vector<8x32xf32> -> vector<8x32xf32>
    %c1_108 = arith.constant 1 : index
    %c0_109 = arith.constant 0 : index
    %c0_110 = arith.constant 0 : index
    %102 = vector.load %arg11[%c1_108, %c0_109, %c0_110] : memref<3x32x32xf32, #tpu.memory_space<vmem>>, vector<1x32x32xf32>
    %103 = vector.shape_cast %102 : vector<1x32x32xf32> to vector<32x32xf32>
    %cst_111 = arith.constant dense<0.000000e+00> : vector<8x32xf32>
    %104 = tpu.matmul %101, %103, %cst_111 {dimension_numbers = #tpu.dot_dimension_numbers<[1], [0], [0], [1], [0, 0, 1, 1], [], []>} : vector<8x32xf32>, vector<32x32xf32>, vector<8x32xf32> -> vector<8x32xf32>
    %105 = arith.addf %98, %104 : vector<8x32xf32>
    %c2_112 = arith.constant 2 : index
    %c0_113 = arith.constant 0 : index
    %c0_114 = arith.constant 0 : index
    %106 = vector.load %arg10[%c2_112, %c0_113, %c0_114] : memref<3x8x8xf32, #tpu.memory_space<vmem>>, vector<1x8x8xf32>
    %107 = vector.shape_cast %106 : vector<1x8x8xf32> to vector<8x8xf32>
    %cst_115 = arith.constant dense<0.000000e+00> : vector<8x32xf32>
    %108 = tpu.matmul %107, %89, %cst_115 {dimension_numbers = #tpu.dot_dimension_numbers<[1], [0], [0], [1], [0, 0, 1, 1], [], []>} : vector<8x8xf32>, vector<8x32xf32>, vector<8x32xf32> -> vector<8x32xf32>
    %c2_116 = arith.constant 2 : index
    %c0_117 = arith.constant 0 : index
    %c0_118 = arith.constant 0 : index
    %109 = vector.load %arg11[%c2_116, %c0_117, %c0_118] : memref<3x32x32xf32, #tpu.memory_space<vmem>>, vector<1x32x32xf32>
    %110 = vector.shape_cast %109 : vector<1x32x32xf32> to vector<32x32xf32>
    %cst_119 = arith.constant dense<0.000000e+00> : vector<8x32xf32>
    %111 = tpu.matmul %108, %110, %cst_119 {dimension_numbers = #tpu.dot_dimension_numbers<[1], [0], [0], [1], [0, 0, 1, 1], [], []>} : vector<8x32xf32>, vector<32x32xf32>, vector<8x32xf32> -> vector<8x32xf32>
    %112 = arith.addf %105, %111 : vector<8x32xf32>
    %cst_120 = arith.constant 0.000000e+00 : f32
    %113 = vector.broadcast %cst_120 : f32 to vector<8x32xf32>
    %114 = arith.maximumf %112, %113 : vector<8x32xf32>
    %c0_121 = arith.constant 0 : index
    %c0_122 = arith.constant 0 : index
    %115 = vector.load %arg15[%c0_121, %c0_122] : memref<1x16xf32, #tpu.memory_space<vmem>>, vector<1x16xf32>
    %c0_123 = arith.constant 0 : index
    %c0_124 = arith.constant 0 : index
    %c0_125 = arith.constant 0 : index
    %116 = vector.load %arg13[%c0_123, %c0_124, %c0_125] : memref<4x4x8xf32, #tpu.memory_space<vmem>>, vector<1x4x8xf32>
    %117 = vector.shape_cast %116 : vector<1x4x8xf32> to vector<4x8xf32>
    %cst_126 = arith.constant dense<0.000000e+00> : vector<4x32xf32>
    %118 = tpu.matmul %117, %114, %cst_126 {dimension_numbers = #tpu.dot_dimension_numbers<[1], [0], [0], [1], [0, 0, 1, 1], [], []>} : vector<4x8xf32>, vector<8x32xf32>, vector<4x32xf32> -> vector<4x32xf32>
    %c0_127 = arith.constant 0 : index
    %c0_128 = arith.constant 0 : index
    %c0_129 = arith.constant 0 : index
    %119 = vector.load %arg14[%c0_127, %c0_128, %c0_129] : memref<4x32x16xf32, #tpu.memory_space<vmem>>, vector<1x32x16xf32>
    %120 = vector.shape_cast %119 : vector<1x32x16xf32> to vector<32x16xf32>
    %cst_130 = arith.constant dense<0.000000e+00> : vector<4x16xf32>
    %121 = tpu.matmul %118, %120, %cst_130 {dimension_numbers = #tpu.dot_dimension_numbers<[1], [0], [0], [1], [0, 0, 1, 1], [], []>} : vector<4x32xf32>, vector<32x16xf32>, vector<4x16xf32> -> vector<4x16xf32>
    %122 = vector.broadcast %115 : vector<1x16xf32> to vector<4x16xf32>
    %123 = arith.addf %122, %121 : vector<4x16xf32>
    %c1_131 = arith.constant 1 : index
    %c0_132 = arith.constant 0 : index
    %c0_133 = arith.constant 0 : index
    %124 = vector.load %arg13[%c1_131, %c0_132, %c0_133] : memref<4x4x8xf32, #tpu.memory_space<vmem>>, vector<1x4x8xf32>
    %125 = vector.shape_cast %124 : vector<1x4x8xf32> to vector<4x8xf32>
    %cst_134 = arith.constant dense<0.000000e+00> : vector<4x32xf32>
    %126 = tpu.matmul %125, %114, %cst_134 {dimension_numbers = #tpu.dot_dimension_numbers<[1], [0], [0], [1], [0, 0, 1, 1], [], []>} : vector<4x8xf32>, vector<8x32xf32>, vector<4x32xf32> -> vector<4x32xf32>
    %c1_135 = arith.constant 1 : index
    %c0_136 = arith.constant 0 : index
    %c0_137 = arith.constant 0 : index
    %127 = vector.load %arg14[%c1_135, %c0_136, %c0_137] : memref<4x32x16xf32, #tpu.memory_space<vmem>>, vector<1x32x16xf32>
    %128 = vector.shape_cast %127 : vector<1x32x16xf32> to vector<32x16xf32>
    %cst_138 = arith.constant dense<0.000000e+00> : vector<4x16xf32>
    %129 = tpu.matmul %126, %128, %cst_138 {dimension_numbers = #tpu.dot_dimension_numbers<[1], [0], [0], [1], [0, 0, 1, 1], [], []>} : vector<4x32xf32>, vector<32x16xf32>, vector<4x16xf32> -> vector<4x16xf32>
    %130 = arith.addf %123, %129 : vector<4x16xf32>
    %c2_139 = arith.constant 2 : index
    %c0_140 = arith.constant 0 : index
    %c0_141 = arith.constant 0 : index
    %131 = vector.load %arg13[%c2_139, %c0_140, %c0_141] : memref<4x4x8xf32, #tpu.memory_space<vmem>>, vector<1x4x8xf32>
    %132 = vector.shape_cast %131 : vector<1x4x8xf32> to vector<4x8xf32>
    %cst_142 = arith.constant dense<0.000000e+00> : vector<4x32xf32>
    %133 = tpu.matmul %132, %114, %cst_142 {dimension_numbers = #tpu.dot_dimension_numbers<[1], [0], [0], [1], [0, 0, 1, 1], [], []>} : vector<4x8xf32>, vector<8x32xf32>, vector<4x32xf32> -> vector<4x32xf32>
    %c2_143 = arith.constant 2 : index
    %c0_144 = arith.constant 0 : index
    %c0_145 = arith.constant 0 : index
    %134 = vector.load %arg14[%c2_143, %c0_144, %c0_145] : memref<4x32x16xf32, #tpu.memory_space<vmem>>, vector<1x32x16xf32>
    %135 = vector.shape_cast %134 : vector<1x32x16xf32> to vector<32x16xf32>
    %cst_146 = arith.constant dense<0.000000e+00> : vector<4x16xf32>
    %136 = tpu.matmul %133, %135, %cst_146 {dimension_numbers = #tpu.dot_dimension_numbers<[1], [0], [0], [1], [0, 0, 1, 1], [], []>} : vector<4x32xf32>, vector<32x16xf32>, vector<4x16xf32> -> vector<4x16xf32>
    %137 = arith.addf %130, %136 : vector<4x16xf32>
    %c3_147 = arith.constant 3 : index
    %c0_148 = arith.constant 0 : index
    %c0_149 = arith.constant 0 : index
    %138 = vector.load %arg13[%c3_147, %c0_148, %c0_149] : memref<4x4x8xf32, #tpu.memory_space<vmem>>, vector<1x4x8xf32>
    %139 = vector.shape_cast %138 : vector<1x4x8xf32> to vector<4x8xf32>
    %cst_150 = arith.constant dense<0.000000e+00> : vector<4x32xf32>
    %140 = tpu.matmul %139, %114, %cst_150 {dimension_numbers = #tpu.dot_dimension_numbers<[1], [0], [0], [1], [0, 0, 1, 1], [], []>} : vector<4x8xf32>, vector<8x32xf32>, vector<4x32xf32> -> vector<4x32xf32>
    %c3_151 = arith.constant 3 : index
    %c0_152 = arith.constant 0 : index
    %c0_153 = arith.constant 0 : index
    %141 = vector.load %arg14[%c3_151, %c0_152, %c0_153] : memref<4x32x16xf32, #tpu.memory_space<vmem>>, vector<1x32x16xf32>
    %142 = vector.shape_cast %141 : vector<1x32x16xf32> to vector<32x16xf32>
    %cst_154 = arith.constant dense<0.000000e+00> : vector<4x16xf32>
    %143 = tpu.matmul %140, %142, %cst_154 {dimension_numbers = #tpu.dot_dimension_numbers<[1], [0], [0], [1], [0, 0, 1, 1], [], []>} : vector<4x32xf32>, vector<32x16xf32>, vector<4x16xf32> -> vector<4x16xf32>
    %144 = arith.addf %137, %143 : vector<4x16xf32>
    %cst_155 = arith.constant 0.000000e+00 : f32
    %145 = vector.broadcast %cst_155 : f32 to vector<4x16xf32>
    %146 = arith.maximumf %144, %145 : vector<4x16xf32>
    %c0_156 = arith.constant 0 : index
    %c0_157 = arith.constant 0 : index
    %147 = vector.load %arg18[%c0_156, %c0_157] : memref<1x16xf32, #tpu.memory_space<vmem>>, vector<1x16xf32>
    %c0_158 = arith.constant 0 : index
    %c0_159 = arith.constant 0 : index
    %c0_160 = arith.constant 0 : index
    %148 = vector.load %arg16[%c0_158, %c0_159, %c0_160] : memref<3x4x4xf32, #tpu.memory_space<vmem>>, vector<1x4x4xf32>
    %149 = vector.shape_cast %148 : vector<1x4x4xf32> to vector<4x4xf32>
    %cst_161 = arith.constant dense<0.000000e+00> : vector<4x16xf32>
    %150 = tpu.matmul %149, %146, %cst_161 {dimension_numbers = #tpu.dot_dimension_numbers<[1], [0], [0], [1], [0, 0, 1, 1], [], []>} : vector<4x4xf32>, vector<4x16xf32>, vector<4x16xf32> -> vector<4x16xf32>
    %c0_162 = arith.constant 0 : index
    %c0_163 = arith.constant 0 : index
    %c0_164 = arith.constant 0 : index
    %151 = vector.load %arg17[%c0_162, %c0_163, %c0_164] : memref<3x16x16xf32, #tpu.memory_space<vmem>>, vector<1x16x16xf32>
    %152 = vector.shape_cast %151 : vector<1x16x16xf32> to vector<16x16xf32>
    %cst_165 = arith.constant dense<0.000000e+00> : vector<4x16xf32>
    %153 = tpu.matmul %150, %152, %cst_165 {dimension_numbers = #tpu.dot_dimension_numbers<[1], [0], [0], [1], [0, 0, 1, 1], [], []>} : vector<4x16xf32>, vector<16x16xf32>, vector<4x16xf32> -> vector<4x16xf32>
    %154 = vector.broadcast %147 : vector<1x16xf32> to vector<4x16xf32>
    %155 = arith.addf %154, %153 : vector<4x16xf32>
    %c1_166 = arith.constant 1 : index
    %c0_167 = arith.constant 0 : index
    %c0_168 = arith.constant 0 : index
    %156 = vector.load %arg16[%c1_166, %c0_167, %c0_168] : memref<3x4x4xf32, #tpu.memory_space<vmem>>, vector<1x4x4xf32>
    %157 = vector.shape_cast %156 : vector<1x4x4xf32> to vector<4x4xf32>
    %cst_169 = arith.constant dense<0.000000e+00> : vector<4x16xf32>
    %158 = tpu.matmul %157, %146, %cst_169 {dimension_numbers = #tpu.dot_dimension_numbers<[1], [0], [0], [1], [0, 0, 1, 1], [], []>} : vector<4x4xf32>, vector<4x16xf32>, vector<4x16xf32> -> vector<4x16xf32>
    %c1_170 = arith.constant 1 : index
    %c0_171 = arith.constant 0 : index
    %c0_172 = arith.constant 0 : index
    %159 = vector.load %arg17[%c1_170, %c0_171, %c0_172] : memref<3x16x16xf32, #tpu.memory_space<vmem>>, vector<1x16x16xf32>
    %160 = vector.shape_cast %159 : vector<1x16x16xf32> to vector<16x16xf32>
    %cst_173 = arith.constant dense<0.000000e+00> : vector<4x16xf32>
    %161 = tpu.matmul %158, %160, %cst_173 {dimension_numbers = #tpu.dot_dimension_numbers<[1], [0], [0], [1], [0, 0, 1, 1], [], []>} : vector<4x16xf32>, vector<16x16xf32>, vector<4x16xf32> -> vector<4x16xf32>
    %162 = arith.addf %155, %161 : vector<4x16xf32>
    %c2_174 = arith.constant 2 : index
    %c0_175 = arith.constant 0 : index
    %c0_176 = arith.constant 0 : index
    %163 = vector.load %arg16[%c2_174, %c0_175, %c0_176] : memref<3x4x4xf32, #tpu.memory_space<vmem>>, vector<1x4x4xf32>
    %164 = vector.shape_cast %163 : vector<1x4x4xf32> to vector<4x4xf32>
    %cst_177 = arith.constant dense<0.000000e+00> : vector<4x16xf32>
    %165 = tpu.matmul %164, %146, %cst_177 {dimension_numbers = #tpu.dot_dimension_numbers<[1], [0], [0], [1], [0, 0, 1, 1], [], []>} : vector<4x4xf32>, vector<4x16xf32>, vector<4x16xf32> -> vector<4x16xf32>
    %c2_178 = arith.constant 2 : index
    %c0_179 = arith.constant 0 : index
    %c0_180 = arith.constant 0 : index
    %166 = vector.load %arg17[%c2_178, %c0_179, %c0_180] : memref<3x16x16xf32, #tpu.memory_space<vmem>>, vector<1x16x16xf32>
    %167 = vector.shape_cast %166 : vector<1x16x16xf32> to vector<16x16xf32>
    %cst_181 = arith.constant dense<0.000000e+00> : vector<4x16xf32>
    %168 = tpu.matmul %165, %167, %cst_181 {dimension_numbers = #tpu.dot_dimension_numbers<[1], [0], [0], [1], [0, 0, 1, 1], [], []>} : vector<4x16xf32>, vector<16x16xf32>, vector<4x16xf32> -> vector<4x16xf32>
    %169 = arith.addf %162, %168 : vector<4x16xf32>
    %cst_182 = arith.constant 0.000000e+00 : f32
    %170 = vector.broadcast %cst_182 : f32 to vector<4x16xf32>
    %171 = arith.maximumf %169, %170 : vector<4x16xf32>
    %c0_183 = arith.constant 0 : index
    %c0_184 = arith.constant 0 : index
    %172 = vector.load %arg21[%c0_183, %c0_184] : memref<1x8xf32, #tpu.memory_space<vmem>>, vector<1x8xf32>
    %c0_185 = arith.constant 0 : index
    %c0_186 = arith.constant 0 : index
    %c0_187 = arith.constant 0 : index
    %173 = vector.load %arg19[%c0_185, %c0_186, %c0_187] : memref<2x2x4xf32, #tpu.memory_space<vmem>>, vector<1x2x4xf32>
    %174 = vector.shape_cast %173 : vector<1x2x4xf32> to vector<2x4xf32>
    %cst_188 = arith.constant dense<0.000000e+00> : vector<2x16xf32>
    %175 = tpu.matmul %174, %171, %cst_188 {dimension_numbers = #tpu.dot_dimension_numbers<[1], [0], [0], [1], [0, 0, 1, 1], [], []>} : vector<2x4xf32>, vector<4x16xf32>, vector<2x16xf32> -> vector<2x16xf32>
    %c0_189 = arith.constant 0 : index
    %c0_190 = arith.constant 0 : index
    %c0_191 = arith.constant 0 : index
    %176 = vector.load %arg20[%c0_189, %c0_190, %c0_191] : memref<2x16x8xf32, #tpu.memory_space<vmem>>, vector<1x16x8xf32>
    %177 = vector.shape_cast %176 : vector<1x16x8xf32> to vector<16x8xf32>
    %cst_192 = arith.constant dense<0.000000e+00> : vector<2x8xf32>
    %178 = tpu.matmul %175, %177, %cst_192 {dimension_numbers = #tpu.dot_dimension_numbers<[1], [0], [0], [1], [0, 0, 1, 1], [], []>} : vector<2x16xf32>, vector<16x8xf32>, vector<2x8xf32> -> vector<2x8xf32>
    %179 = vector.broadcast %172 : vector<1x8xf32> to vector<2x8xf32>
    %180 = arith.addf %179, %178 : vector<2x8xf32>
    %c1_193 = arith.constant 1 : index
    %c0_194 = arith.constant 0 : index
    %c0_195 = arith.constant 0 : index
    %181 = vector.load %arg19[%c1_193, %c0_194, %c0_195] : memref<2x2x4xf32, #tpu.memory_space<vmem>>, vector<1x2x4xf32>
    %182 = vector.shape_cast %181 : vector<1x2x4xf32> to vector<2x4xf32>
    %cst_196 = arith.constant dense<0.000000e+00> : vector<2x16xf32>
    %183 = tpu.matmul %182, %171, %cst_196 {dimension_numbers = #tpu.dot_dimension_numbers<[1], [0], [0], [1], [0, 0, 1, 1], [], []>} : vector<2x4xf32>, vector<4x16xf32>, vector<2x16xf32> -> vector<2x16xf32>
    %c1_197 = arith.constant 1 : index
    %c0_198 = arith.constant 0 : index
    %c0_199 = arith.constant 0 : index
    %184 = vector.load %arg20[%c1_197, %c0_198, %c0_199] : memref<2x16x8xf32, #tpu.memory_space<vmem>>, vector<1x16x8xf32>
    %185 = vector.shape_cast %184 : vector<1x16x8xf32> to vector<16x8xf32>
    %cst_200 = arith.constant dense<0.000000e+00> : vector<2x8xf32>
    %186 = tpu.matmul %183, %185, %cst_200 {dimension_numbers = #tpu.dot_dimension_numbers<[1], [0], [0], [1], [0, 0, 1, 1], [], []>} : vector<2x16xf32>, vector<16x8xf32>, vector<2x8xf32> -> vector<2x8xf32>
    %187 = arith.addf %180, %186 : vector<2x8xf32>
    %cst_201 = arith.constant 0.000000e+00 : f32
    %188 = vector.broadcast %cst_201 : f32 to vector<2x8xf32>
    %189 = arith.maximumf %187, %188 : vector<2x8xf32>
    %c0_202 = arith.constant 0 : index
    %c0_203 = arith.constant 0 : index
    %190 = vector.load %arg24[%c0_202, %c0_203] : memref<1x8xf32, #tpu.memory_space<vmem>>, vector<1x8xf32>
    %c0_204 = arith.constant 0 : index
    %c0_205 = arith.constant 0 : index
    %c0_206 = arith.constant 0 : index
    %191 = vector.load %arg22[%c0_204, %c0_205, %c0_206] : memref<1x2x2xf32, #tpu.memory_space<vmem>>, vector<1x2x2xf32>
    %192 = vector.shape_cast %191 : vector<1x2x2xf32> to vector<2x2xf32>
    %cst_207 = arith.constant dense<0.000000e+00> : vector<2x8xf32>
    %193 = tpu.matmul %192, %189, %cst_207 {dimension_numbers = #tpu.dot_dimension_numbers<[1], [0], [0], [1], [0, 0, 1, 1], [], []>} : vector<2x2xf32>, vector<2x8xf32>, vector<2x8xf32> -> vector<2x8xf32>
    %c0_208 = arith.constant 0 : index
    %c0_209 = arith.constant 0 : index
    %c0_210 = arith.constant 0 : index
    %194 = vector.load %arg23[%c0_208, %c0_209, %c0_210] : memref<1x8x8xf32, #tpu.memory_space<vmem>>, vector<1x8x8xf32>
    %195 = vector.shape_cast %194 : vector<1x8x8xf32> to vector<8x8xf32>
    %cst_211 = arith.constant dense<0.000000e+00> : vector<2x8xf32>
    %196 = tpu.matmul %193, %195, %cst_211 {dimension_numbers = #tpu.dot_dimension_numbers<[1], [0], [0], [1], [0, 0, 1, 1], [], []>} : vector<2x8xf32>, vector<8x8xf32>, vector<2x8xf32> -> vector<2x8xf32>
    %197 = vector.broadcast %190 : vector<1x8xf32> to vector<2x8xf32>
    %198 = arith.addf %197, %196 : vector<2x8xf32>
    %cst_212 = arith.constant 0.000000e+00 : f32
    %199 = vector.broadcast %cst_212 : f32 to vector<2x8xf32>
    %200 = arith.maximumf %198, %199 : vector<2x8xf32>
    %c0_213 = arith.constant 0 : index
    %c0_214 = arith.constant 0 : index
    %201 = vector.load %arg26[%c0_213, %c0_214] : memref<1x8xf32, #tpu.memory_space<vmem>>, vector<1x8xf32>
    %c0_215 = arith.constant 0 : index
    %c0_216 = arith.constant 0 : index
    %c0_217 = arith.constant 0 : index
    %202 = vector.load %arg25[%c0_215, %c0_216, %c0_217] : memref<1x8x8xf32, #tpu.memory_space<vmem>>, vector<1x8x8xf32>
    %203 = vector.shape_cast %202 : vector<1x8x8xf32> to vector<8x8xf32>
    %cst_218 = arith.constant dense<0.000000e+00> : vector<2x8xf32>
    %204 = tpu.matmul %200, %203, %cst_218 {dimension_numbers = #tpu.dot_dimension_numbers<[1], [0], [0], [1], [0, 0, 1, 1], [], []>} : vector<2x8xf32>, vector<8x8xf32>, vector<2x8xf32> -> vector<2x8xf32>
    %205 = vector.broadcast %201 : vector<1x8xf32> to vector<2x8xf32>
    %206 = arith.addf %205, %204 : vector<2x8xf32>
    %cst_219 = arith.constant 0.000000e+00 : f32
    %207 = vector.broadcast %cst_219 : f32 to vector<2x8xf32>
    %208 = arith.maximumf %206, %207 : vector<2x8xf32>
    %c0_220 = arith.constant 0 : index
    %c0_221 = arith.constant 0 : index
    %209 = vector.load %arg28[%c0_220, %c0_221] : memref<1x8xf32, #tpu.memory_space<vmem>>, vector<1x8xf32>
    %c0_222 = arith.constant 0 : index
    %c0_223 = arith.constant 0 : index
    %c0_224 = arith.constant 0 : index
    %210 = vector.load %arg27[%c0_222, %c0_223, %c0_224] : memref<1x8x8xf32, #tpu.memory_space<vmem>>, vector<1x8x8xf32>
    %211 = vector.shape_cast %210 : vector<1x8x8xf32> to vector<8x8xf32>
    %cst_225 = arith.constant dense<0.000000e+00> : vector<2x8xf32>
    %212 = tpu.matmul %208, %211, %cst_225 {dimension_numbers = #tpu.dot_dimension_numbers<[1], [0], [0], [1], [0, 0, 1, 1], [], []>} : vector<2x8xf32>, vector<8x8xf32>, vector<2x8xf32> -> vector<2x8xf32>
    %213 = vector.broadcast %209 : vector<1x8xf32> to vector<2x8xf32>
    %214 = arith.addf %213, %212 : vector<2x8xf32>
    %cst_226 = arith.constant 0.000000e+00 : f32
    %215 = vector.broadcast %cst_226 : f32 to vector<2x8xf32>
    %216 = arith.maximumf %214, %215 : vector<2x8xf32>
    %c0_227 = arith.constant 0 : index
    %c0_228 = arith.constant 0 : index
    %217 = vector.load %arg30[%c0_227, %c0_228] : memref<1x8xf32, #tpu.memory_space<vmem>>, vector<1x8xf32>
    %c0_229 = arith.constant 0 : index
    %c0_230 = arith.constant 0 : index
    %c0_231 = arith.constant 0 : index
    %218 = vector.load %arg29[%c0_229, %c0_230, %c0_231] : memref<1x8x8xf32, #tpu.memory_space<vmem>>, vector<1x8x8xf32>
    %219 = vector.shape_cast %218 : vector<1x8x8xf32> to vector<8x8xf32>
    %cst_232 = arith.constant dense<0.000000e+00> : vector<2x8xf32>
    %220 = tpu.matmul %216, %219, %cst_232 {dimension_numbers = #tpu.dot_dimension_numbers<[1], [0], [0], [1], [0, 0, 1, 1], [], []>} : vector<2x8xf32>, vector<8x8xf32>, vector<2x8xf32> -> vector<2x8xf32>
    %221 = vector.broadcast %217 : vector<1x8xf32> to vector<2x8xf32>
    %222 = arith.addf %221, %220 : vector<2x8xf32>
    %c0_233 = arith.constant 0 : index
    %c0_234 = arith.constant 0 : index
    %223 = vector.load %arg32[%c0_233, %c0_234] : memref<1x16xf32, #tpu.memory_space<vmem>>, vector<1x16xf32>
    %c0_235 = arith.constant 0 : index
    %c0_236 = arith.constant 0 : index
    %c0_237 = arith.constant 0 : index
    %224 = vector.load %arg31[%c0_235, %c0_236, %c0_237] : memref<1x8x16xf32, #tpu.memory_space<vmem>>, vector<1x8x16xf32>
    %225 = vector.shape_cast %224 : vector<1x8x16xf32> to vector<8x16xf32>
    %cst_238 = arith.constant dense<0.000000e+00> : vector<2x16xf32>
    %226 = tpu.matmul %222, %225, %cst_238 {dimension_numbers = #tpu.dot_dimension_numbers<[1], [0], [0], [1], [0, 0, 1, 1], [], []>} : vector<2x8xf32>, vector<8x16xf32>, vector<2x16xf32> -> vector<2x16xf32>
    %227 = vector.broadcast %223 : vector<1x16xf32> to vector<2x16xf32>
    %228 = arith.addf %227, %226 : vector<2x16xf32>
    %c0_239 = arith.constant 0 : index
    %c0_240 = arith.constant 0 : index
    %229 = vector.load %arg33[%c0_239, %c0_240] : memref<2x16xf32, #tpu.memory_space<vmem>>, vector<2x16xf32>
    tpu.vector_store %arg33[%c0_239, %c0_240], %228 {strides = array<i32>} : memref<2x16xf32, #tpu.memory_space<vmem>>, vector<2x16xf32>,
    return
  }
}

</mosaic_0001>

<bundles_post_ra>
// kernel: forward.1
= control target key start
LH: loop header
LB: loop body
LE: loop exit
PB: predicated region body
PF: predicated region fallthrough
CT: control target
= control target key end

     0   :  { %s5720_s6 = smov 1   ;;  %s5721_s10 = smov 2   ;;  %vm145_vm0 = vcmask 261120   ;;  %vm235_vm1 = vcmask 523264   ;;  %vm858_vm2 = vcmask 130048   ;;  %vm5726_vm3 = vmmov 0   ;;  %s6234_s0 = inlined_call_operand.smem [shape: u32[34], index: -1, kind: input, shape index: {}] }
   0x1   :  { %s1_s5 = sld [smem:[%s6234_s0]]   ;;  %s5722_s14 = smov 4   ;;  %vm2031_vm4 = vcmask 64512   ;;  %vm3126_vm5 = vcmask 1043456   ;;  %vm3122_vm6 = vcmask 31744   ;;  %vm3906_vm7 = vcmask 1041408  }
   0x2   :  { %s5767_s9 = sld [smem:[%s6234_s0 + %s5720_s6]]   ;;  %s5723_s18 = smov 3   ;;  %vm3902_vm8 = vcmask 15360   ;;  %vm4392_vm9 = vcmask 123904  }
   0x3   :  { %s5772_s13 = sld [smem:[%s6234_s0 + %s5721_s10]]   ;;  %s5724_s22 = smov 5  }
   0x4   :  { %s5833_s17 = sld [smem:[%s6234_s0 + %s5722_s14]]   ;;  %s5728_s26 = smov 6  }
   0x5   :  { %s4400_s21 = sld [smem:[%s6234_s0 + %s5723_s18]]   ;;  %s5729_s30 = smov 8  }
   0x6   :  { %s5843_s25 = sld [smem:[%s6234_s0 + %s5724_s22]]   ;;  %s5730_s4 = smov 7  }
   0x7   :  { %v138_v0 = vld [vmem:[%s1_s5] sm:$0xff]  ;;  %v139_v1 = vld [vmem:[%s1_s5 + $0x8] sm:$0xff]  ;;  %v140_v2 = vld [vmem:[%s1_s5 + $0x10] sm:$0xff]  ;;  %s4403_s29 = sld [smem:[%s6234_s0 + %s5728_s26]]   ;;  %s5731_s8 = smov 9  }
   0x8   :  { %v5370_v3 = vpack.c.bf16 %v139_v1, %v138_v0  ;;  %v141_v4 = vld [vmem:[%s1_s5 + $0x18] sm:$0xff]  ;;  %v143_v5 = vld [vmem:[%s5767_s9] sm:$0xff]  ;;  %v144_v15 = vld [vmem:[%s5767_s9 + $0x8] sm:$0xff]  ;;  %s5897_s3 = sld [smem:[%s6234_s0 + %s5729_s30]]   ;;  %s5732_s12 = smov 11  }
   0x9   :  { %v5374_v6 = vpack.c.bf16 %v141_v4, %v140_v2  ;;  %4874 = vmatprep.mubr.msk.f32.mxu0 %vm145_vm0, %v143_v5  ;;  %v227_v7 = vld [vmem:[%s5772_s13] sm:$0xff]  ;;  %v228_v8 = vld [vmem:[%s5772_s13 + $0x8] sm:$0xff]  ;;  %v229_v9 = vld [vmem:[%s5772_s13 + $0x10] sm:$0xff]  ;;  %s5902_s7 = sld [smem:[%s6234_s0 + %s5730_s4]]   ;;  %s5733_s16 = smov 10  }
   0xa   :  { %5371 = vmatprep.subr.bf16.mxu0 %v5370_v3  ;;  %v5378_v10 = vpack.c.bf16 %v228_v8, %v227_v7  ;;  %v230_v11 = vld [vmem:[%s5772_s13 + $0x18] sm:$0xff]  ;;  %v231_v13 = vld [vmem:[%s5772_s13 + $0x20] sm:$0xff]  ;;  %v232_v14 = vld [vmem:[%s5772_s13 + $0x28] sm:$0xff]  ;;  %s4406_s11 = sld [smem:[%s6234_s0 + %s5731_s8]]   ;;  %s5734_s20 = smov 14  }
   0xb   :  { %5373 = vmatpush3.bf16.msra.mxu0 %v5370_v3  ;;  %v5382_v12 = vpack.c.bf16 %v230_v11, %v229_v9  ;;  %v4436_v16 = vld [vmem:[%s5767_s9 + $0x10] sm:$0xff]  ;;  %v5386_v17 = vpack.c.bf16 %v232_v14, %v231_v13  ;;  %v234_v19 = vld [vmem:[%s5772_s13 + $0x38] sm:$0xff]  ;;  %v4450_v22 = vld [vmem:[%s5767_s9 + $0x20] sm:$0xff]  ;;  %s5990_s15 = sld [smem:[%s6234_s0 + %s5732_s12]]   ;;  %s5735_s24 = smov 12  }
   0xc   :  { %5375 = vmatprep.subr.bf16.mxu0 %v5374_v6  ;;  %5379 = vmatprep.subr.bf16.mxu1 %v5378_v10  ;;  %v233_v18 = vld [vmem:[%s5772_s13 + $0x30] sm:$0xff]  ;;  %v4437_v21 = vld [vmem:[%s5767_s9 + $0x18] sm:$0xff]  ;;  %v4451_v23 = vld [vmem:[%s5767_s9 + $0x28] sm:$0xff]  ;;  %s5995_s19 = sld [smem:[%s6234_s0 + %s5733_s16]]   ;;  %s5736_s28 = smov 13  }
   0xd   :  { %5381 = vmatpush3.bf16.msra.mxu1 %v5378_v10  ;;  %v5390_v20 = vpack.c.bf16 %v234_v19, %v233_v18  ;;  %v4464_v24 = vld [vmem:[%s5767_s9 + $0x30] sm:$0xff]  ;;  %v4465_v25 = vld [vmem:[%s5767_s9 + $0x38] sm:$0xff]  ;;  %v4440_v26 = vld [vmem:[%s5772_s13 + $0x40] sm:$0xff]  ;;  %s6042_s23 = sld [smem:[%s6234_s0 + %s5734_s20]]   ;;  %s5737_s2 = smov 15  }
   0xe   :  { %5383 = vmatprep.subr.bf16.mxu1 %v5382_v12  ;;  %v4441_v27 = vld [vmem:[%s5772_s13 + $0x48] sm:$0xff]  ;;  %v4442_v29 = vld [vmem:[%s5772_s13 + $0x50] sm:$0xff]  ;;  %v4443_v30 = vld [vmem:[%s5772_s13 + $0x58] sm:$0xff]  ;;  %s4409_s27 = sld [smem:[%s6234_s0 + %s5735_s24]]   ;;  %s5738_s6 = smov 17  }
   0xf   :  { %5377 = vmatpush3.bf16.msra.mxu0 %v5374_v6  ;;  %v5402_v28 = vpack.c.bf16 %v4441_v27, %v4440_v26  ;;  %v5406_v33 = vpack.c.bf16 %v4443_v30, %v4442_v29  ;;  %v4444_v34 = vld [vmem:[%s5772_s13 + $0x60] sm:$0xff]  ;;  %v4445_v35 = vld [vmem:[%s5772_s13 + $0x68] sm:$0xff]  ;;  %v4446_v37 = vld [vmem:[%s5772_s13 + $0x70] sm:$0xff]  ;;  %s4410_s1 = sld [smem:[%s6234_s0 + %s5736_s28]]   ;;  %s5739_s10 = smov 16  }
  0x10   :  { %5395 = vmatprep.subr.bf16.mxu0 %v5370_v3  ;;  %v5410_v36 = vpack.c.bf16 %v4445_v35, %v4444_v34  ;;  %v4447_v38 = vld [vmem:[%s5772_s13 + $0x78] sm:$0xff]  ;;  %v4454_v42 = vld [vmem:[%s5772_s13 + $0x80] sm:$0xff]  ;;  %v4455_v43 = vld [vmem:[%s5772_s13 + $0x88] sm:$0xff]  ;;  %s4412_s5 = sld [smem:[%s6234_s0 + %s5737_s2]]   ;;  %s5740_s14 = smov 18  }
  0x11   :  { %5385 = vmatpush3.bf16.msra.mxu1 %v5382_v12  ;;  %v5414_v40 = vpack.c.bf16 %v4447_v38, %v4446_v37  ;;  %v5426_v44 = vpack.c.bf16 %v4455_v43, %v4454_v42  ;;  %v4456_v45 = vld [vmem:[%s5772_s13 + $0x90] sm:$0xff]  ;;  %v4457_v46 = vld [vmem:[%s5772_s13 + $0x98] sm:$0xff]  ;;  %v4458_v50 = vld [vmem:[%s5772_s13 + $0xa0] sm:$0xff]  ;;  %s6108_s9 = sld [smem:[%s6234_s0 + %s5738_s6]]   ;;  %s5741_s18 = smov 20  }
  0x12   :  { %4875 = vmatmul.mubr.msk.f32.vlgmr.msra.gmra.mrb[0].mxu0 %vm145_vm0, %v144_v15  ;;  %5387 = vmatprep.subr.bf16.mxu1 %v5386_v17  ;;  %v5430_v48 = vpack.c.bf16 %v4457_v46, %v4456_v45  ;;  %v4459_v51 = vld [vmem:[%s5772_s13 + $0xa8] sm:$0xff]  ;;  %v4460_v53 = vld [vmem:[%s5772_s13 + $0xb0] sm:$0xff]  ;;  %v4461_v54 = vld [vmem:[%s5772_s13 + $0xb8] sm:$0xff]  ;;  %s5742_s22 = smov 19   ;;  %s5743_s26 = smov 23  }
  0x13   :  { %5397 = vmatpush3.bf16.msra.mxu0 %v5370_v3  ;;  %4904 = vmatprep.mubr.msk.f32.mxu0 %vm145_vm0, %v4436_v16  ;;  %v5434_v52 = vpack.c.bf16 %v4459_v51, %v4458_v50  ;;  %v5438_v56 = vpack.c.bf16 %v4461_v54, %v4460_v53  ;;  %v4468_v58 = vld [vmem:[%s5772_s13 + $0xc0] sm:$0xff]  ;;  %v4469_v59 = vld [vmem:[%s5772_s13 + $0xc8] sm:$0xff]  ;;  %v4470_v61 = vld [vmem:[%s5772_s13 + $0xd0] sm:$0xff]  ;;  %s5744_s30 = smov 21   ;;  %s5745_s4 = smov 22  }
  0x14   :  { %5399 = vmatprep.subr.bf16.mxu0 %v5374_v6  ;;  %v5450_v60 = vpack.c.bf16 %v4469_v59, %v4468_v58  ;;  %v4471_v62 = vld [vmem:[%s5772_s13 + $0xd8] sm:$0xff]  ;;  %v4472_v0 = vld [vmem:[%s5772_s13 + $0xe0] sm:$0xff]  ;;  %v4473_v1 = vld [vmem:[%s5772_s13 + $0xe8] sm:$0xff]  ;;  %s5746_s8 = smov 25   ;;  %s5747_s12 = smov 24  }
  0x15   :  { %5389 = vmatpush3.bf16.msra.mxu1 %v5386_v17  ;;  %v5454_v63 = vpack.c.bf16 %v4471_v62, %v4470_v61  ;;  %v5458_v2 = vpack.c.bf16 %v4473_v1, %v4472_v0  ;;  %v4475_v4 = vld [vmem:[%s5772_s13 + $0xf8] sm:$0xff]  ;;  %v4435_v7 = vld [vmem:[%s4400_s21] ss:$0 sm:$0xff]  ;;  %v941_v14 = vld [vmem:[%s5843_s25 + $0x8] sm:$0xff]  ;;  %v5725_v62 = vmov 0.0|0.0   ;;  %s4417_s21 = sld [smem:[%s6234_s0 + %s5741_s18]]   ;;  %s5748_s16 = smov 27  }
  0x16   :  { %5391 = vmatprep.subr.bf16.mxu1 %v5390_v20  ;;  %v940_v13 = vld [vmem:[%s5843_s25] sm:$0xff]  ;;  %v942_v18 = vld [vmem:[%s5843_s25 + $0x10] sm:$0xff]  ;;  %v943_v19 = vld [vmem:[%s5843_s25 + $0x18] sm:$0xff]  ;;  %s5749_s20 = smov 26   ;;  %s5750_s24 = smov 29  }
  0x17   :  { %5401 = vmatpush3.bf16.msra.mxu0 %v5374_v6  ;;  %v5470_v17 = vpack.c.bf16 %v941_v14, %v940_v13  ;;  %v947_v26 = vld [vmem:[%s5843_s25 + $0x38] sm:$0xff]  ;;  %v4498_v29 = vld [vmem:[%s5833_s17 + $0x28] sm:$0xff]  ;;  %v4487_v30 = vld [vmem:[%s5843_s25 + $0x40] sm:$0xff]  ;;  %s5751_s28 = smov 28   ;;  %s5752_s2 = smov 31  }
  0x18   :  { %5419 = vmatprep.subr.bf16.mxu0 %v5370_v3  ;;  %v4483_v34 = vld [vmem:[%s5833_s17 + $0x10] sm:$0xff]  ;;  %v4490_v37 = vld [vmem:[%s5843_s25 + $0x58] sm:$0xff]  ;;  %v4501_v46 = vld [vmem:[%s5843_s25 + $0x80] sm:$0xff]  ;;  %s5753_s6 = smov 30  }
  0x19   :  { %5393 = vmatpush3.bf16.msra.mxu1 %v5390_v20  ;;  %v857_v20 = vld [vmem:[%s5833_s17 + $0x8] sm:$0xff]  ;;  %v4484_v38 = vld [vmem:[%s5833_s17 + $0x18] sm:$0xff]  ;;  %v4493_v43 = vld [vmem:[%s5843_s25 + $0x70] sm:$0xff] }
  0x1a   :  { %4905 = vmatmul.mubr.msk.f32.vlgmr.msra.gmra.mrb[2].mxu0 %vm145_vm0, %v4437_v21  ;;  %5403 = vmatprep.subr.bf16.mxu1 %v5402_v28  ;;  %v5474_v21 = vpack.c.bf16 %v943_v19, %v942_v18  ;;  %v4503_v51 = vld [vmem:[%s5843_s25 + $0x90] sm:$0xff]  ;;  %v4482_v0 = vld [vmem:[%s4403_s29] ss:$0 sm:$0xff]  ;;  %v1469_v14 = vld [vmem:[%s5897_s3 + $0x18] sm:$0xff]  ;;  %s4420_s29 = sld [smem:[%s6234_s0 + %s5743_s26]]  }
  0x1b   :  { %5421 = vmatpush3.bf16.msra.mxu0 %v5370_v3  ;;  %4934 = vmatprep.mubr.msk.f32.mxu0 %vm145_vm0, %v4450_v22  ;;  %v944_v22 = vld [vmem:[%s5843_s25 + $0x20] sm:$0xff]  ;;  %v4507_v59 = vld [vmem:[%s5843_s25 + $0xb0] sm:$0xff]  ;;  %v1471_v18 = vld [vmem:[%s5897_s3 + $0x28] sm:$0xff] }
  0x1c   :  { %5423 = vmatprep.subr.bf16.mxu0 %v5374_v6  ;;  %v1468_v13 = vld [vmem:[%s5897_s3 + $0x10] sm:$0xff]  ;;  %v4536_v19 = vld [vmem:[%s5902_s7 + $0x18] sm:$0xff] }
  0x1f   :  { %5425 = vmatpush3.bf16.msra.mxu0 %v5374_v6 }
  0x20   :  { %5443 = vmatprep.subr.bf16.mxu0 %v5370_v3 }
  0x22   :  { %4935 = vmatmul.mubr.msk.f32.vlgmr.msra.gmra.mrb[4].mxu0 %vm145_vm0, %v4451_v23  ;;  %v945_v23 = vld [vmem:[%s5843_s25 + $0x28] sm:$0xff] }
  0x23   :  { %5445 = vmatpush3.bf16.msra.mxu0 %v5370_v3  ;;  %4964 = vmatprep.mubr.msk.f32.mxu0 %vm145_vm0, %v4464_v24  ;;  %v4474_v3 = vld [vmem:[%s5772_s13 + $0xf0] sm:$0xff]  ;;  %v5478_v24 = vpack.c.bf16 %v945_v23, %v944_v22  ;;  %v1473_v22 = vld [vmem:[%s5897_s3 + $0x38] sm:$0xff]  ;;  %s6113_s13 = sld [smem:[%s6234_s0 + %s5739_s10]]   ;;  %s5754_s10 = smov 32  }
  0x24   :  { %5447 = vmatprep.subr.bf16.mxu0 %v5374_v6  ;;  %v5462_v5 = vpack.c.bf16 %v4475_v4, %v4474_v3 }
  0x27   :  { %5449 = vmatpush3.bf16.msra.mxu0 %v5374_v6  ;;  %v856_v6 = vld [vmem:[%s5833_s17] sm:$0xff] }
  0x2a   :  { %4965 = vmatmul.mubr.msk.f32.vlgmr.msra.gmra.mrb[6].mxu0 %vm145_vm0, %v4465_v25  ;;  %v946_v25 = vld [vmem:[%s5843_s25 + $0x30] sm:$0xff] }
  0x2b   :  { %4990 = vmatprep.mubr.msk.f32.mxu0 %vm858_vm2, %v856_v6  ;;  %v5482_v27 = vpack.c.bf16 %v947_v26, %v946_v25  ;;  %v4517_v25 = vld [vmem:[%s5897_s3 + $0x48] sm:$0xff] }
  0xe5   :  { %v4876_v31 = vpop.f32.mrb[0].mxu0 }
  0xe6   :  { %v218_v32 = vpop.f32.mrb[1].mxu0 }
  0xe7   :  { %4893 = vmatprep.mubr.msk.f32.mxu1 %vm235_vm1, %v218_v32 }
  0xe8   :  { %4894 = vmatmul.mubr.msk.f32.vlgmr.msra.gmra.mrb[0].mxu1 %vm235_vm1, %v4876_v31  ;;  %v4488_v31 = vld [vmem:[%s5843_s25 + $0x48] sm:$0xff] }
  0xe9   :  { %5405 = vmatpush3.bf16.msra.mxu1 %v5402_v28  ;;  %v4497_v28 = vld [vmem:[%s5833_s17 + $0x20] sm:$0xff]  ;;  %v5490_v35 = vpack.c.bf16 %v4488_v31, %v4487_v30  ;;  %s4415_s17 = sld [smem:[%s6234_s0 + %s5740_s14]]   ;;  %s5755_s14 = smov 33  }
  0xea   :  { %5407 = vmatprep.subr.bf16.mxu1 %v5406_v33 }
  0xed   :  { %5409 = vmatpush3.bf16.msra.mxu1 %v5406_v33  ;;  %v4906_v39 = vpop.f32.mrb[2].mxu0 }
  0xee   :  { %5411 = vmatprep.subr.bf16.mxu1 %v5410_v36  ;;  %v400_v41 = vpop.f32.mrb[3].mxu0 }
  0xef   :  { %4923 = vmatprep.mubr.msk.f32.mxu1 %vm235_vm1, %v400_v41  ;;  %v4492_v41 = vld [vmem:[%s5843_s25 + $0x68] sm:$0xff] }
  0xf1   :  { %5413 = vmatpush3.bf16.msra.mxu1 %v5410_v36  ;;  %v4489_v36 = vld [vmem:[%s5843_s25 + $0x50] sm:$0xff] }
  0xf2   :  { %5415 = vmatprep.subr.bf16.mxu1 %v5414_v40 }
  0xf5   :  { %5417 = vmatpush3.bf16.msra.mxu1 %v5414_v40  ;;  %v4936_v47 = vpop.f32.mrb[4].mxu0  ;;  %v4491_v40 = vld [vmem:[%s5843_s25 + $0x60] sm:$0xff] }
  0xf6   :  { %5427 = vmatprep.subr.bf16.mxu1 %v5426_v44  ;;  %v576_v49 = vpop.f32.mrb[5].mxu0  ;;  %v5498_v42 = vpack.c.bf16 %v4492_v41, %v4491_v40  ;;  %v4523_v40 = vld [vmem:[%s5897_s3 + $0x78] sm:$0xff] }
  0xf8   :  { %4924 = vmatmul.mubr.msk.f32.vlgmr.msra.gmra.mrb[0].mxu1 %vm235_vm1, %v4906_v39  ;;  %v5494_v39 = vpack.c.bf16 %v4490_v37, %v4489_v36 }
  0xf9   :  { %5429 = vmatpush3.bf16.msra.mxu1 %v5426_v44  ;;  %4953 = vmatprep.mubr.msk.f32.mxu1 %vm235_vm1, %v576_v49  ;;  %v4494_v44 = vld [vmem:[%s5843_s25 + $0x78] sm:$0xff] }
  0xfa   :  { %5431 = vmatprep.subr.bf16.mxu1 %v5430_v48  ;;  %v5502_v45 = vpack.c.bf16 %v4494_v44, %v4493_v43  ;;  %v4527_v44 = vld [vmem:[%s5897_s3 + $0x80] sm:$0xff] }
  0xfd   :  { %5433 = vmatpush3.bf16.msra.mxu1 %v5430_v48  ;;  %v4966_v55 = vpop.f32.mrb[6].mxu0 }
  0xfe   :  { %5435 = vmatprep.subr.bf16.mxu1 %v5434_v52  ;;  %v752_v57 = vpop.f32.mrb[7].mxu0 }
 0x101   :  { %5437 = vmatpush3.bf16.msra.mxu1 %v5434_v52  ;;  %v4504_v52 = vld [vmem:[%s5843_s25 + $0x98] sm:$0xff] }
 0x102   :  { %5439 = vmatprep.subr.bf16.mxu1 %v5438_v56 }
 0x105   :  { %5441 = vmatpush3.bf16.msra.mxu1 %v5438_v56  ;;  %v4505_v56 = vld [vmem:[%s5843_s25 + $0xa0] sm:$0xff] }
 0x106   :  { %5451 = vmatprep.subr.bf16.mxu1 %v5450_v60 }
 0x108   :  { %4954 = vmatmul.mubr.msk.f32.vlgmr.msra.gmra.mrb[0].mxu1 %vm235_vm1, %v4936_v47  ;;  %v4502_v47 = vld [vmem:[%s5843_s25 + $0x88] sm:$0xff] }
 0x109   :  { %5453 = vmatpush3.bf16.msra.mxu1 %v5450_v60  ;;  %4983 = vmatprep.mubr.msk.f32.mxu1 %vm235_vm1, %v752_v57  ;;  %v5510_v48 = vpack.c.bf16 %v4502_v47, %v4501_v46  ;;  %v4506_v57 = vld [vmem:[%s5843_s25 + $0xa8] sm:$0xff]  ;;  %v4508_v60 = vld [vmem:[%s5843_s25 + $0xb8] sm:$0xff]  ;;  %v4529_v47 = vld [vmem:[%s5897_s3 + $0x90] sm:$0xff]  ;;  %s4416_s25 = sld [smem:[%s6234_s0 + %s5742_s22]]  }
 0x10a   :  { %5455 = vmatprep.subr.bf16.mxu1 %v5454_v63  ;;  %v5518_v58 = vpack.c.bf16 %v4506_v57, %v4505_v56  ;;  %v5522_v61 = vpack.c.bf16 %v4508_v60, %v4507_v59  ;;  %v4538_v56 = vld [vmem:[%s5897_s3 + $0xc0] sm:$0xff]  ;;  %v4539_v57 = vld [vmem:[%s5897_s3 + $0xc8] sm:$0xff]  ;;  %v4540_v59 = vld [vmem:[%s5897_s3 + $0xd0] sm:$0xff] }
 0x10b   :  { %v4541_v60 = vld [vmem:[%s5897_s3 + $0xd8] sm:$0xff] }
 0x10d   :  { %5457 = vmatpush3.bf16.msra.mxu1 %v5454_v63  ;;  %v5727_v63 = vmov 0.0  }
 0x10e   :  { %5459 = vmatprep.subr.bf16.mxu1 %v5458_v2 }
 0x111   :  { %5461 = vmatpush3.bf16.msra.mxu1 %v5458_v2 }
 0x112   :  { %5463 = vmatprep.subr.bf16.mxu1 %v5462_v5 }
 0x115   :  { %5465 = vmatpush3.bf16.msra.mxu1 %v5462_v5 }
 0x118   :  { %4984 = vmatmul.mubr.msk.f32.vlgmr.msra.gmra.mrb[0].mxu1 %vm235_vm1, %v4966_v55  ;;  %v5514_v55 = vpack.c.bf16 %v4504_v52, %v4503_v51  ;;  %v4532_v51 = vld [vmem:[%s5897_s3 + $0xa8] sm:$0xff] }
 0x119   :  { %5042 = vmatprep.mubr.msk.f32.mxu1 %vm858_vm2, %v4497_v28  ;;  %v4519_v28 = vld [vmem:[%s5897_s3 + $0x58] sm:$0xff] }
 0x1eb   :  { %v4985_v8 = vpop.f32.mrb[0].mxu1 }
 0x1ec   :  { %v5643_v9 = vadd.f32 %v4985_v8, %v4435_v7  ;;  %v842_v10 = vpop.f32.mrb[1].mxu1  ;;  %v1466_v8 = vld [vmem:[%s5897_s3] sm:$0xff] }
 0x1ed   :  { %v5644_v11 = vadd.f32 %v4435_v7, %v842_v10  ;;  %v1392_v10 = vld [vmem:[%s5902_s7] sm:$0xff] }
 0x1ee   :  { %v854_v12 = vmax.f32 %v5643_v9, 0.0  ;;  %v1467_v9 = vld [vmem:[%s5897_s3 + $0x8] sm:$0xff] }
 0x1ef   :  { %v853_v15 = vmax.f32 %v5644_v11, 0.0  ;;  %v4514_v11 = vld [vmem:[%s5902_s7 + $0x8] sm:$0xff] }
 0x1f1   :  { %v5466_v16 = vpack.c.bf16 %v854_v12, %v853_v15  ;;  %v5530_v12 = vpack.c.bf16 %v1467_v9, %v1466_v8  ;;  %v4525_v15 = vld [vmem:[%s5902_s7 + $0x10] sm:$0xff]  ;;  %v2105_v8 = vld [vmem:[%s5990_s15] sm:$0xff]  ;;  %v2106_v9 = vld [vmem:[%s5990_s15 + $0x8] sm:$0xff]  ;;  %s4419_s7 = sld [smem:[%s6234_s0 + %s5745_s4]]  }
 0x1f3   :  { %5467 = vmatprep.subr.bf16.mxu0 %v5466_v16  ;;  %5507 = vmatprep.subr.bf16.mxu1 %v5466_v16 }
 0x1f4   :  { %5469 = vmatpush3.bf16.msra.mxu0 %v5466_v16  ;;  %5509 = vmatpush3.bf16.msra.mxu1 %v5466_v16 }
 0x1f5   :  { %5471 = vmatprep.subr.bf16.mxu0 %v5470_v17  ;;  %5526 = vmatprep.subr.bf16.mxu1 %v5725_v62 }
 0x1f7   :  { %4991 = vmatmul.mubr.msk.f32.vlgmr.msra.gmra.mrb[8].mxu0 %vm858_vm2, %v857_v20  ;;  %5043 = vmatmul.mubr.msk.f32.vlgmr.msra.gmra.mrb[2].mxu1 %vm858_vm2, %v4498_v29 }
 0x1f8   :  { %5473 = vmatpush3.bf16.msra.mxu0 %v5470_v17  ;;  %5068 = vmatprep.mubr.msk.f32.mxu1 %vm5726_vm3, %v5727_v63  ;;  %v1470_v17 = vld [vmem:[%s5897_s3 + $0x20] sm:$0xff] }
 0x1f9   :  { %5475 = vmatprep.subr.bf16.mxu0 %v5474_v21  ;;  %v5536_v20 = vpack.c.bf16 %v1471_v18, %v1470_v17  ;;  %v4552_v18 = vld [vmem:[%s5990_s15 + $0x20] sm:$0xff] }
 0x1fc   :  { %5477 = vmatpush3.bf16.msra.mxu0 %v5474_v21  ;;  %v1472_v21 = vld [vmem:[%s5897_s3 + $0x30] sm:$0xff] }
 0x1fd   :  { %5479 = vmatprep.subr.bf16.mxu0 %v5478_v24  ;;  %v5539_v23 = vpack.c.bf16 %v1473_v22, %v1472_v21  ;;  %v4550_v22 = vld [vmem:[%s5995_s19 + $0x8] sm:$0xff] }
 0x200   :  { %5481 = vmatpush3.bf16.msra.mxu0 %v5478_v24  ;;  %v4516_v24 = vld [vmem:[%s5897_s3 + $0x40] sm:$0xff] }
 0x201   :  { %5483 = vmatprep.subr.bf16.mxu0 %v5482_v27  ;;  %v5545_v26 = vpack.c.bf16 %v4517_v25, %v4516_v24  ;;  %v4554_v24 = vld [vmem:[%s5990_s15 + $0x30] sm:$0xff]  ;;  %v4555_v25 = vld [vmem:[%s5990_s15 + $0x38] sm:$0xff] }
 0x204   :  { %5485 = vmatpush3.bf16.msra.mxu0 %v5482_v27  ;;  %v4518_v27 = vld [vmem:[%s5897_s3 + $0x50] sm:$0xff] }
 0x205   :  { %5487 = vmatprep.subr.bf16.mxu0 %v5466_v16 }
 0x2ca   :  { %v4992_v32 = vpop.f32.mrb[8].mxu0  ;;  %v5044_v49 = vpop.f32.mrb[2].mxu1 }
 0x2cb   :  { %v931_v33 = vpop.f32.mrb[9].mxu0  ;;  %v1288_v50 = vpop.f32.mrb[3].mxu1 }
 0x2cc   :  { %5009 = vmatprep.mubr.msk.f32.mxu0 %vm235_vm1, %v931_v33  ;;  %v5548_v33 = vpack.c.bf16 %v4519_v28, %v4518_v27  ;;  %v4559_v27 = vld [vmem:[%s5990_s15 + $0x40] sm:$0xff]  ;;  %v4560_v28 = vld [vmem:[%s5990_s15 + $0x48] sm:$0xff] }
 0x2cd   :  { %5010 = vmatmul.mubr.msk.f32.vlgmr.msra.gmra.mrb[10].mxu0 %vm235_vm1, %v4992_v32 }
 0x2ce   :  { %5489 = vmatpush3.bf16.msra.mxu0 %v5466_v16  ;;  %5016 = vmatprep.mubr.msk.f32.mxu0 %vm858_vm2, %v4483_v34  ;;  %v5533_v16 = vpack.c.bf16 %v1469_v14, %v1468_v13  ;;  %v4520_v34 = vld [vmem:[%s5897_s3 + $0x60] sm:$0xff]  ;;  %v5587_v14 = vpack.c.bf16 %v2106_v9, %v2105_v8 }
 0x2cf   :  { %5491 = vmatprep.subr.bf16.mxu0 %v5490_v35  ;;  %v2030_v13 = vld [vmem:[%s5995_s19] sm:$0xff] }
 0x2d0   :  { %v4583_v9 = vld [vmem:[%s6042_s23 + $0x60] sm:$0xff] }
 0x2d1   :  { %5017 = vmatmul.mubr.msk.f32.vlgmr.msra.gmra.mrb[12].mxu0 %vm858_vm2, %v4484_v38 }
 0x2d2   :  { %5493 = vmatpush3.bf16.msra.mxu0 %v5490_v35  ;;  %v4521_v35 = vld [vmem:[%s5897_s3 + $0x68] sm:$0xff] }
 0x2d3   :  { %5495 = vmatprep.subr.bf16.mxu0 %v5494_v39  ;;  %v5551_v38 = vpack.c.bf16 %v4521_v35, %v4520_v34  ;;  %v4562_v34 = vld [vmem:[%s5990_s15 + $0x58] sm:$0xff] }
 0x2d6   :  { %5497 = vmatpush3.bf16.msra.mxu0 %v5494_v39  ;;  %v4522_v39 = vld [vmem:[%s5897_s3 + $0x70] sm:$0xff] }
 0x2d7   :  { %5499 = vmatprep.subr.bf16.mxu0 %v5498_v42  ;;  %v5554_v43 = vpack.c.bf16 %v4523_v40, %v4522_v39  ;;  %v2574_v39 = vld [vmem:[%s6042_s23 + $0x8] sm:$0xff]  ;;  %v2575_v40 = vld [vmem:[%s6042_s23 + $0x10] sm:$0xff] }
 0x2da   :  { %5501 = vmatpush3.bf16.msra.mxu0 %v5498_v42 }
 0x2db   :  { %5503 = vmatprep.subr.bf16.mxu0 %v5502_v45 }
 0x2de   :  { %5505 = vmatpush3.bf16.msra.mxu0 %v5502_v45  ;;  %v4528_v45 = vld [vmem:[%s5897_s3 + $0x88] sm:$0xff] }
 0x2df   :  { %5511 = vmatprep.subr.bf16.mxu0 %v5510_v48  ;;  %v5560_v46 = vpack.c.bf16 %v4528_v45, %v4527_v44  ;;  %v4549_v44 = vld [vmem:[%s4409_s27] ss:$0 sm:$0xff]  ;;  %s4426_s27 = sld [smem:[%s6234_s0 + %s5750_s24]]  }
 0x3a4   :  { %v5018_v53 = vpop.f32.mrb[12].mxu0 }
 0x3a5   :  { %v1112_v54 = vpop.f32.mrb[13].mxu0 }
 0x3a6   :  { %5035 = vmatprep.mubr.msk.f32.mxu0 %vm235_vm1, %v1112_v54  ;;  %v4534_v54 = vld [vmem:[%s5897_s3 + $0xb8] sm:$0xff] }
 0x3a7   :  { %5036 = vmatmul.mubr.msk.f32.vlgmr.msra.gmra.mrb[10].mxu0 %vm235_vm1, %v5018_v53  ;;  %v4533_v53 = vld [vmem:[%s5897_s3 + $0xb0] sm:$0xff] }
 0x3a8   :  { %5513 = vmatpush3.bf16.msra.mxu0 %v5510_v48  ;;  %5061 = vmatprep.mubr.msk.f32.mxu0 %vm235_vm1, %v1288_v50  ;;  %v4530_v48 = vld [vmem:[%s5897_s3 + $0x98] sm:$0xff]  ;;  %v4531_v50 = vld [vmem:[%s5897_s3 + $0xa0] sm:$0xff] }
 0x3a9   :  { %5515 = vmatprep.subr.bf16.mxu0 %v5514_v55  ;;  %v5566_v52 = vpack.c.bf16 %v4532_v51, %v4531_v50  ;;  %v4567_v50 = vld [vmem:[%s4410_s1 + $0x4] sm:$0xf]  ;;  %v4574_v51 = vld [vmem:[%s4410_s1 + $0x8] sm:$0xf] }
 0x3ac   :  { %5517 = vmatpush3.bf16.msra.mxu0 %v5514_v55  ;;  %v5569_v55 = vpack.c.bf16 %v4534_v54, %v4533_v53  ;;  %v4569_v53 = vld [vmem:[%s6042_s23 + $0x20] sm:$0xff]  ;;  %v4570_v54 = vld [vmem:[%s6042_s23 + $0x28] sm:$0xff] }
 0x3ad   :  { %5519 = vmatprep.subr.bf16.mxu0 %v5518_v58 }
 0x3b0   :  { %5521 = vmatpush3.bf16.msra.mxu0 %v5518_v58  ;;  %v5575_v58 = vpack.c.bf16 %v4539_v57, %v4538_v56  ;;  %v4571_v56 = vld [vmem:[%s6042_s23 + $0x30] sm:$0xff]  ;;  %v4572_v57 = vld [vmem:[%s6042_s23 + $0x38] sm:$0xff] }
 0x3b1   :  { %5523 = vmatprep.subr.bf16.mxu0 %v5522_v61 }
 0x3b4   :  { %5525 = vmatpush3.bf16.msra.mxu0 %v5522_v61  ;;  %v5578_v61 = vpack.c.bf16 %v4541_v60, %v4540_v59  ;;  %v5614_v60 = vpack.c.bf16 %v4572_v57, %v4571_v56 }
 0x3b5   :  { %5541 = vmatprep.subr.bf16.mxu0 %v5725_v62 }
 0x3b7   :  { %5062 = vmatmul.mubr.msk.f32.vlgmr.msra.gmra.mrb[10].mxu0 %vm235_vm1, %v5044_v49  ;;  %v5563_v49 = vpack.c.bf16 %v4530_v48, %v4529_v47 }
 0x3b8   :  { %5094 = vmatprep.mubr.msk.f32.mxu0 %vm5726_vm3, %v5727_v63 }
 0x48a   :  { %v5063_v1 = vpop.f32.mrb[10].mxu0 }
 0x48b   :  { %v5645_v2 = vadd.f32 %v5063_v1, %v4482_v0  ;;  %v1378_v3 = vpop.f32.mrb[11].mxu0  ;;  %v4543_v1 = vld [vmem:[%s5897_s3 + $0xe8] sm:$0xff] }
 0x48c   :  { %v5646_v4 = vadd.f32 %v4482_v0, %v1378_v3  ;;  %v4542_v0 = vld [vmem:[%s5897_s3 + $0xe0] sm:$0xff]  ;;  %v4544_v3 = vld [vmem:[%s5897_s3 + $0xf0] sm:$0xff] }
 0x48d   :  { %v1390_v5 = vmax.f32 %v5645_v2, 0.0  ;;  %v5581_v2 = vpack.c.bf16 %v4543_v1, %v4542_v0  ;;  %v4577_v0 = vld [vmem:[%s6042_s23 + $0x48] sm:$0xff] }
 0x48e   :  { %v1389_v6 = vmax.f32 %v5646_v4, 0.0  ;;  %v4545_v4 = vld [vmem:[%s5897_s3 + $0xf8] sm:$0xff]  ;;  %s4418_s3 = sld [smem:[%s6234_s0 + %s5744_s30]]  }
 0x490   :  { %v5527_v7 = vpack.c.bf16 %v1390_v5, %v1389_v6  ;;  %v5584_v5 = vpack.c.bf16 %v4545_v4, %v4544_v3  ;;  %v4513_v6 = vld [vmem:[%s4406_s11] ss:$0 sm:$0xff]  ;;  %v4578_v4 = vld [vmem:[%s6042_s23 + $0x50] sm:$0xff]  ;;  %s4422_s11 = sld [smem:[%s6234_s0 + %s5746_s8]]  }
 0x492   :  { %5528 = vmatpush3.bf16.msra.mxu1 %v5527_v7  ;;  %5543 = vmatpush3.bf16.msra.mxu0 %v5527_v7 }
 0x493   :  { %5556 = vmatprep.subr.bf16.mxu0 %v5725_v62  ;;  %5529 = vmatprep.subr.bf16.mxu1 %v5725_v62 }
 0x494   :  { %v4607_v57 = vld [vmem:[%s4418_s3] ss:$0 sm:$0xff] }
 0x495   :  { %5069 = vmatmul.mubr.msk.f32.vlgmr.msra.gmra.mrb[4].mxu1 %vm858_vm2, %v1392_v10  ;;  %5095 = vmatmul.mubr.msk.f32.vlgmr.msra.gmra.mrb[14].mxu0 %vm858_vm2, %v4514_v11 }
 0x496   :  { %5558 = vmatpush3.bf16.msra.mxu0 %v5527_v7  ;;  %5120 = vmatprep.mubr.msk.f32.mxu0 %vm5726_vm3, %v5727_v63 }
 0x497   :  { %5571 = vmatprep.subr.bf16.mxu0 %v5725_v62  ;;  %5531 = vmatpush3.bf16.msra.mxu1 %v5530_v12 }
 0x498   :  { %5532 = vmatprep.subr.bf16.mxu1 %v5725_v62  ;;  %5087 = vmatprep.mubr.msk.f32.mxu1 %vm5726_vm3, %v5727_v63 }
 0x499   :  { %5121 = vmatmul.mubr.msk.f32.vlgmr.msra.gmra.mrb[16].mxu0 %vm858_vm2, %v4525_v15  ;;  %v2107_v15 = vld [vmem:[%s5990_s15 + $0x10] sm:$0xff] }
 0x49a   :  { %5573 = vmatpush3.bf16.msra.mxu0 %v5527_v7  ;;  %5146 = vmatprep.mubr.msk.f32.mxu0 %vm5726_vm3, %v5727_v63 }
 0x49b   :  { %5534 = vmatpush3.bf16.msra.mxu1 %v5533_v16  ;;  %5168 = vmatprep.subr.mxu0 %v5727_v63  ;;  %v2108_v16 = vld [vmem:[%s5990_s15 + $0x18] sm:$0xff] }
 0x49c   :  { %5535 = vmatprep.subr.bf16.mxu1 %v5725_v62  ;;  %v5590_v17 = vpack.c.bf16 %v2108_v16, %v2107_v15  ;;  %v4586_v15 = vld [vmem:[%s6042_s23 + $0x78] sm:$0xff] }
 0x49d   :  { %5147 = vmatmul.mubr.msk.f32.vlgmr.msra.gmra.mrb[18].mxu0 %vm858_vm2, %v4536_v19  ;;  %v4553_v19 = vld [vmem:[%s5990_s15 + $0x28] sm:$0xff] }
 0x49e   :  { %5170 = vmatprep.mubr.msk.f32.mxu0 %vm5726_vm3, %v5727_v63 }
 0x49f   :  { %5537 = vmatpush3.bf16.msra.mxu1 %v5536_v20 }
 0x4a0   :  { %5538 = vmatprep.subr.bf16.mxu1 %v5725_v62 }
 0x4a3   :  { %5540 = vmatpush3.bf16.msra.mxu1 %v5539_v23  ;;  %v5593_v23 = vpack.c.bf16 %v4553_v19, %v4552_v18  ;;  %v3200_v19 = vld [vmem:[%s6108_s9] sm:$0xff] }
 0x4a4   :  { %5544 = vmatprep.subr.bf16.mxu1 %v5725_v62 }
 0x568   :  { %v1462_v29 = vpop.f32.mrb[4].mxu1  ;;  %v1625_v30 = vpop.f32.mrb[14].mxu0 }
 0x569   :  { %v5070_v31 = vpop.f32.mrb[5].mxu1  ;;  %5088 = vmatmul.mubr.msk.f32.vlgmr.msra.gmra.mrb[6].mxu1 %vm235_vm1, %v1462_v29  ;;  %v5096_v32 = vpop.f32.mrb[15].mxu0 }
 0x56a   :  { %5546 = vmatpush3.bf16.msra.mxu1 %v5545_v26  ;;  %5113 = vmatprep.mubr.msk.f32.mxu1 %vm5726_vm3, %v5727_v63  ;;  %v5596_v26 = vpack.c.bf16 %v4555_v25, %v4554_v24  ;;  %v4557_v31 = vld [vmem:[%s5995_s19 + $0x10] sm:$0xff]  ;;  %v5599_v32 = vpack.c.bf16 %v4560_v28, %v4559_v27  ;;  %v3121_v24 = vld [vmem:[%s6113_s13] sm:$0xf]  ;;  %v4596_v27 = vld [vmem:[%s6108_s9 + $0x18] sm:$0xff]  ;;  %s4424_s19 = sld [smem:[%s6234_s0 + %s5748_s16]]  }
 0x56b   :  { %5547 = vmatprep.subr.bf16.mxu1 %v5725_v62 }
 0x56c   :  { %v1783_v36 = vpop.f32.mrb[16].mxu0 }
 0x56d   :  { %v5122_v37 = vpop.f32.mrb[17].mxu0 }
 0x56e   :  { %5549 = vmatpush3.bf16.msra.mxu1 %v5548_v33  ;;  %v4561_v33 = vld [vmem:[%s5990_s15 + $0x50] sm:$0xff]  ;;  %s4421_s15 = sld [smem:[%s6234_s0 + %s5747_s12]]  }
 0x56f   :  { %5550 = vmatprep.subr.bf16.mxu1 %v5725_v62  ;;  %v5602_v35 = vpack.c.bf16 %v4562_v34, %v4561_v33  ;;  %v4602_v33 = vld [vmem:[%s6108_s9 + $0x28] sm:$0xff] }
 0x570   :  { %v1941_v41 = vpop.f32.mrb[18].mxu0 }
 0x571   :  { %v5148_v42 = vpop.f32.mrb[19].mxu0 }
 0x572   :  { %5552 = vmatpush3.bf16.msra.mxu1 %v5551_v38  ;;  %v2573_v38 = vld [vmem:[%s6042_s23] sm:$0xff]  ;;  %v2576_v42 = vld [vmem:[%s6042_s23 + $0x18] sm:$0xff] }
 0x573   :  { %5553 = vmatprep.subr.bf16.mxu1 %v5725_v62 }
 0x576   :  { %5555 = vmatpush3.bf16.msra.mxu1 %v5554_v43  ;;  %v5608_v43 = vpack.c.bf16 %v2576_v42, %v2575_v40  ;;  %v4591_v40 = vld [vmem:[%s4415_s17] ss:$0 sm:$0xff]  ;;  %s4430_s17 = sld [smem:[%s6234_s0 + %s5755_s14]]  }
 0x577   :  { %5559 = vmatprep.subr.bf16.mxu1 %v5725_v62 }
 0x579   :  { %5114 = vmatmul.mubr.msk.f32.vlgmr.msra.gmra.mrb[6].mxu1 %vm235_vm1, %v1625_v30 }
 0x57a   :  { %5561 = vmatpush3.bf16.msra.mxu1 %v5560_v46  ;;  %5139 = vmatprep.mubr.msk.f32.mxu1 %vm5726_vm3, %v5727_v63 }
 0x57b   :  { %5562 = vmatprep.subr.bf16.mxu1 %v5725_v62 }
 0x57e   :  { %5564 = vmatpush3.bf16.msra.mxu1 %v5563_v49  ;;  %v2499_v49 = vld [vmem:[%s4410_s1] sm:$0xf] }
 0x57f   :  { %5565 = vmatprep.subr.bf16.mxu1 %v5725_v62 }
 0x582   :  { %5567 = vmatpush3.bf16.msra.mxu1 %v5566_v52  ;;  %v4581_v52 = vld [vmem:[%s4410_s1 + $0xc] sm:$0xf]  ;;  %s4425_s1 = sld [smem:[%s6234_s0 + %s5751_s28]]  }
 0x583   :  { %5568 = vmatprep.subr.bf16.mxu1 %v5725_v62 }
 0x586   :  { %5570 = vmatpush3.bf16.msra.mxu1 %v5569_v55  ;;  %v5611_v55 = vpack.c.bf16 %v4570_v54, %v4569_v53 }
 0x587   :  { %5574 = vmatprep.subr.bf16.mxu1 %v5725_v62 }
 0x589   :  { %5140 = vmatmul.mubr.msk.f32.vlgmr.msra.gmra.mrb[6].mxu1 %vm235_vm1, %v1783_v36 }
 0x58a   :  { %5576 = vmatpush3.bf16.msra.mxu1 %v5575_v58  ;;  %5165 = vmatprep.mubr.msk.f32.mxu1 %vm5726_vm3, %v5727_v63 }
 0x58b   :  { %5577 = vmatprep.subr.bf16.mxu1 %v5725_v62 }
 0x58e   :  { %5579 = vmatpush3.bf16.msra.mxu1 %v5578_v61  ;;  %v4576_v61 = vld [vmem:[%s6042_s23 + $0x40] sm:$0xff] }
 0x58f   :  { %5580 = vmatprep.subr.bf16.mxu1 %v5725_v62  ;;  %v5617_v3 = vpack.c.bf16 %v4577_v0, %v4576_v61  ;;  %v3901_v0 = vld [vmem:[%s4419_s7] sm:$0x3] }
 0x592   :  { %5582 = vmatpush3.bf16.msra.mxu1 %v5581_v2 }
 0x593   :  { %5583 = vmatprep.subr.bf16.mxu1 %v5725_v62 }
 0x596   :  { %5585 = vmatpush3.bf16.msra.mxu1 %v5584_v5  ;;  %v4579_v5 = vld [vmem:[%s6042_s23 + $0x58] sm:$0xff] }
 0x597   :  { %5604 = vmatprep.subr.bf16.mxu1 %v5725_v62  ;;  %v5620_v8 = vpack.c.bf16 %v4579_v5, %v4578_v4  ;;  %v4617_v4 = vld [vmem:[%s4421_s15] ss:$0 sm:$0xff] }
 0x599   :  { %5166 = vmatmul.mubr.msk.f32.vlgmr.msra.gmra.mrb[6].mxu1 %vm235_vm1, %v1941_v41  ;;  %v5605_v41 = vpack.c.bf16 %v2574_v39, %v2573_v38 }
 0x59a   :  { %5229 = vmatprep.mubr.msk.f32.mxu1 %vm5726_vm3, %v5727_v63 }
 0x59b   :  { %5606 = vmatpush3.bf16.msra.mxu1 %v5605_v41 }
 0x59c   :  { %5607 = vmatprep.subr.bf16.mxu1 %v5725_v62 }
 0x59f   :  { %5609 = vmatpush3.bf16.msra.mxu1 %v5608_v43 }
 0x5a0   :  { %5610 = vmatprep.subr.bf16.mxu1 %v5725_v62 }
 0x66c   :  { %v2023_v7 = vpop.f32.mrb[6].mxu1 }
 0x66d   :  { %v5647_v10 = vadd.f32 %v4513_v6, %v2023_v7  ;;  %v5167_v11 = vpop.f32.mrb[7].mxu1 }
 0x66f   :  { %v2028_v12 = vmax.f32 %v5647_v10, 0.0  ;;  %v4584_v10 = vld [vmem:[%s6042_s23 + $0x68] sm:$0xff] }
 0x671   :  { %5169 = vmatpush3.msra.mxu0 %v2028_v12 }
 0x672   :  { %5171 = vmatmul.mubr.msk.f32.vlgmr.msra.gmra.mrb[20].mxu0 %vm2031_vm4, %v2030_v13  ;;  %5586 = vmatprep.subr.bf16.mxu0 %v5725_v62  ;;  %v5623_v13 = vpack.c.bf16 %v4584_v10, %v4583_v9  ;;  %v4146_v9 = vld [vmem:[%s4424_s19] sm:$0xff] }
 0x673   :  { %5588 = vmatpush3.bf16.msra.mxu0 %v5587_v14  ;;  %5181 = vmatprep.mubr.msk.f32.mxu0 %vm5726_vm3, %v5727_v63  ;;  %v4585_v14 = vld [vmem:[%s6042_s23 + $0x70] sm:$0xff]  ;;  %s4423_s23 = sld [smem:[%s6234_s0 + %s5749_s20]]  }
 0x674   :  { %5589 = vmatprep.subr.bf16.mxu0 %v5725_v62  ;;  %v5626_v16 = vpack.c.bf16 %v4586_v15, %v4585_v14  ;;  %v4229_v15 = vld [vmem:[%s4426_s27] sm:$0xff] }
 0x677   :  { %5591 = vmatpush3.bf16.msra.mxu0 %v5590_v17  ;;  %v4566_v17 = vld [vmem:[%s4412_s5] ss:$0 sm:$0xff]  ;;  %s4428_s5 = sld [smem:[%s6234_s0 + %s5752_s2]]  }
 0x678   :  { %5184 = vmatprep.subr.mxu0 %v5727_v63 }
 0x679   :  { %v4619_v10 = vld [vmem:[%s4423_s23] ss:$0 sm:$0xff] }
 0x745   :  { %v2101_v20 = vpop.f32.mrb[20].mxu0 }
 0x746   :  { %v5172_v21 = vpop.f32.mrb[21].mxu0  ;;  %5182 = vmatmul.mubr.msk.f32.vlgmr.msra.gmra.mrb[22].mxu0 %vm145_vm0, %v2101_v20  ;;  %v3201_v20 = vld [vmem:[%s6108_s9 + $0x8] sm:$0xff] }
 0x747   :  { %5185 = vmatpush3.msra.mxu0 %v2028_v12  ;;  %5186 = vmatprep.mubr.msk.f32.mxu0 %vm5726_vm3, %v5727_v63  ;;  %v5629_v25 = vpack.c.bf16 %v3201_v20, %v3200_v19 }
 0x748   :  { %5592 = vmatprep.subr.bf16.mxu0 %v5725_v62 }
 0x74a   :  { %5187 = vmatmul.mubr.msk.f32.vlgmr.msra.gmra.mrb[24].mxu0 %vm2031_vm4, %v4550_v22 }
 0x74b   :  { %5594 = vmatpush3.bf16.msra.mxu0 %v5593_v23  ;;  %5197 = vmatprep.mubr.msk.f32.mxu0 %vm5726_vm3, %v5727_v63 }
 0x74c   :  { %5595 = vmatprep.subr.bf16.mxu0 %v5725_v62 }
 0x74f   :  { %5597 = vmatpush3.bf16.msra.mxu0 %v5596_v26  ;;  %v4595_v26 = vld [vmem:[%s6108_s9 + $0x10] sm:$0xff] }
 0x750   :  { %5200 = vmatprep.subr.mxu0 %v5727_v63 }
 0x81d   :  { %v2260_v29 = vpop.f32.mrb[24].mxu0 }
 0x81e   :  { %v5188_v30 = vpop.f32.mrb[25].mxu0  ;;  %5198 = vmatmul.mubr.msk.f32.vlgmr.msra.gmra.mrb[22].mxu0 %vm145_vm0, %v2260_v29 }
 0x81f   :  { %5201 = vmatpush3.msra.mxu0 %v2028_v12  ;;  %5202 = vmatprep.mubr.msk.f32.mxu0 %vm5726_vm3, %v5727_v63  ;;  %v4592_v30 = vld [vmem:[%s6113_s13 + $0x4] sm:$0xf] }
 0x820   :  { %5598 = vmatprep.subr.bf16.mxu0 %v5725_v62 }
 0x822   :  { %5203 = vmatmul.mubr.msk.f32.vlgmr.msra.gmra.mrb[26].mxu0 %vm2031_vm4, %v4557_v31  ;;  %v5632_v31 = vpack.c.bf16 %v4596_v27, %v4595_v26 }
 0x823   :  { %5600 = vmatpush3.bf16.msra.mxu0 %v5599_v32  ;;  %5213 = vmatprep.mubr.msk.f32.mxu0 %vm5726_vm3, %v5727_v63  ;;  %v4601_v32 = vld [vmem:[%s6108_s9 + $0x20] sm:$0xff]  ;;  %s4427_s9 = sld [smem:[%s6234_s0 + %s5753_s6]]  }
 0x824   :  { %5601 = vmatprep.subr.bf16.mxu0 %v5725_v62 }
 0x827   :  { %5603 = vmatpush3.bf16.msra.mxu0 %v5602_v35 }
 0x828   :  { %5216 = vmatprep.subr.mxu0 %v5727_v63 }
 0x8f5   :  { %v2414_v36 = vpop.f32.mrb[26].mxu0 }
 0x8f6   :  { %v5204_v37 = vpop.f32.mrb[27].mxu0  ;;  %5214 = vmatmul.mubr.msk.f32.vlgmr.msra.gmra.mrb[22].mxu0 %vm145_vm0, %v2414_v36  ;;  %v4598_v36 = vld [vmem:[%s6113_s13 + $0x8] sm:$0xf]  ;;  %s4429_s13 = sld [smem:[%s6234_s0 + %s5754_s10]]  }
 0x8f7   :  { %5218 = vmatprep.mubr.msk.f32.mxu0 %vm5726_vm3, %v5727_v63  ;;  %v5635_v37 = vpack.c.bf16 %v4602_v33, %v4601_v32 }
 0x9c9   :  { %v2492_v45 = vpop.f32.mrb[22].mxu0 }
 0x9ca   :  { %v5648_v46 = vadd.f32 %v4549_v44, %v2492_v45  ;;  %v5215_v47 = vpop.f32.mrb[23].mxu0  ;;  %v3665_v44 = vld [vmem:[%s4417_s21] sm:$0xff]  ;;  %v3666_v45 = vld [vmem:[%s4417_s21 + $0x8] sm:$0xff] }
 0x9cb   :  { %v3588_v47 = vld [vmem:[%s4416_s25] sm:$0x3] }
 0x9cc   :  { %v2497_v48 = vmax.f32 %v5648_v46, 0.0 }
 0x9ce   :  { %5217 = vmatpush3.msra.mxu0 %v2497_v48 }
 0x9cf   :  { %5219 = vmatmul.mubr.msk.f32.vlgmr.msra.gmra.mrb[28].mxu0 %vm2031_vm4, %v2499_v49  ;;  %5232 = vmatprep.subr.mxu0 %v5727_v63  ;;  %v5638_v49 = vpack.c.bf16 %v3666_v45, %v3665_v44 }
 0x9d0   :  { %5233 = vmatpush3.msra.mxu0 %v2497_v48  ;;  %5234 = vmatprep.mubr.msk.f32.mxu0 %vm5726_vm3, %v5727_v63 }
 0x9d1   :  { %5248 = vmatprep.subr.mxu0 %v5727_v63 }
 0x9d3   :  { %5235 = vmatmul.mubr.msk.f32.vlgmr.msra.gmra.mrb[30].mxu0 %vm2031_vm4, %v4567_v50  ;;  %v4611_v50 = vld [vmem:[%s4417_s21 + $0x10] sm:$0xff] }
 0x9d4   :  { %5249 = vmatpush3.msra.mxu0 %v2497_v48  ;;  %5250 = vmatprep.mubr.msk.f32.mxu0 %vm5726_vm3, %v5727_v63 }
 0x9d5   :  { %5264 = vmatprep.subr.mxu0 %v5727_v63 }
 0x9d7   :  { %5251 = vmatmul.mubr.msk.f32.vlgmr.msra.gmra.mrb[32].mxu0 %vm2031_vm4, %v4574_v51  ;;  %v4612_v51 = vld [vmem:[%s4417_s21 + $0x18] sm:$0xff] }
 0x9d8   :  { %5265 = vmatpush3.msra.mxu0 %v2497_v48  ;;  %5266 = vmatprep.mubr.msk.f32.mxu0 %vm5726_vm3, %v5727_v63  ;;  %v4608_v48 = vld [vmem:[%s4416_s25 + $0x2] sm:$0x3] }
 0x9d9   :  { %5280 = vmatprep.subr.mxu0 %v5727_v63 }
 0x9db   :  { %5267 = vmatmul.mubr.msk.f32.vlgmr.msra.gmra.mrb[34].mxu0 %vm2031_vm4, %v4581_v52  ;;  %v5641_v52 = vpack.c.bf16 %v4612_v51, %v4611_v50 }
 0x9dc   :  { %5282 = vmatprep.mubr.msk.f32.mxu0 %vm5726_vm3, %v5727_v63 }
 0xaa2   :  { %v2569_v58 = vpop.f32.mrb[28].mxu0 }
 0xaa3   :  { %v5220_v59 = vpop.f32.mrb[29].mxu0  ;;  %5230 = vmatmul.mubr.msk.f32.vlgmr.msra.gmra.mrb[8].mxu1 %vm145_vm0, %v2569_v58 }
 0xaa4   :  { %5612 = vmatpush3.bf16.msra.mxu1 %v5611_v55  ;;  %5245 = vmatprep.mubr.msk.f32.mxu1 %vm5726_vm3, %v5727_v63 }
 0xaa5   :  { %5613 = vmatprep.subr.bf16.mxu1 %v5725_v62 }
 0xaa6   :  { %v2728_v1 = vpop.f32.mrb[30].mxu0 }
 0xaa7   :  { %v5236_v2 = vpop.f32.mrb[31].mxu0 }
 0xaa8   :  { %5615 = vmatpush3.bf16.msra.mxu1 %v5614_v60 }
 0xaa9   :  { %5616 = vmatprep.subr.bf16.mxu1 %v5725_v62 }
 0xaaa   :  { %v2882_v6 = vpop.f32.mrb[32].mxu0 }
 0xaab   :  { %5246 = vmatmul.mubr.msk.f32.vlgmr.msra.gmra.mrb[8].mxu1 %vm145_vm0, %v2728_v1  ;;  %v5252_v7 = vpop.f32.mrb[33].mxu0 }
 0xaac   :  { %5618 = vmatpush3.bf16.msra.mxu1 %v5617_v3  ;;  %5261 = vmatprep.mubr.msk.f32.mxu1 %vm5726_vm3, %v5727_v63  ;;  %v4063_v3 = vld [vmem:[%s4422_s11] sm:$0xff] }
 0xaad   :  { %5619 = vmatprep.subr.bf16.mxu1 %v5725_v62 }
 0xaae   :  { %v3036_v11 = vpop.f32.mrb[34].mxu0 }
 0xaaf   :  { %v5268_v12 = vpop.f32.mrb[35].mxu0 }
 0xab0   :  { %5621 = vmatpush3.bf16.msra.mxu1 %v5620_v8 }
 0xab1   :  { %5622 = vmatprep.subr.bf16.mxu1 %v5725_v62 }
 0xab3   :  { %5262 = vmatmul.mubr.msk.f32.vlgmr.msra.gmra.mrb[8].mxu1 %vm145_vm0, %v2882_v6 }
 0xab4   :  { %5624 = vmatpush3.bf16.msra.mxu1 %v5623_v13  ;;  %5277 = vmatprep.mubr.msk.f32.mxu1 %vm5726_vm3, %v5727_v63 }
 0xab5   :  { %5625 = vmatprep.subr.bf16.mxu1 %v5725_v62 }
 0xab8   :  { %5627 = vmatpush3.bf16.msra.mxu1 %v5626_v16  ;;  %v4621_v16 = vld [vmem:[%s4425_s1] ss:$0 sm:$0xff] }
 0xab9   :  { %5316 = vmatprep.subr.mxu1 %v5727_v63 }
 0xabb   :  { %5278 = vmatmul.mubr.msk.f32.vlgmr.msra.gmra.mrb[8].mxu1 %vm145_vm0, %v3036_v11 }
 0xabc   :  { %5318 = vmatprep.mubr.msk.f32.mxu1 %vm5726_vm3, %v5727_v63 }
 0xb8e   :  { %v3114_v18 = vpop.f32.mrb[8].mxu1 }
 0xb8f   :  { %v5649_v21 = vadd.f32 %v4566_v17, %v3114_v18  ;;  %v5279_v22 = vpop.f32.mrb[9].mxu1 }
 0xb91   :  { %v3119_v23 = vmax.f32 %v5649_v21, 0.0  ;;  %v4623_v21 = vld [vmem:[%s4427_s9] ss:$0 sm:$0xff] }
 0xb93   :  { %5281 = vmatpush3.msk.msra.mxu0 %vm3126_vm5, %v3119_v23 }
 0xb94   :  { %5283 = vmatmul.mubr.msk.f32.vlgmr.msra.gmra.mrb[36].mxu0 %vm3122_vm6, %v3121_v24  ;;  %5628 = vmatprep.subr.bf16.mxu0 %v5725_v62 }
 0xb95   :  { %5630 = vmatpush3.bf16.msra.mxu0 %v5629_v25  ;;  %5289 = vmatprep.mubr.msk.f32.mxu0 %vm5726_vm3, %v5727_v63  ;;  %v4625_v25 = vld [vmem:[%s4429_s13] ss:$0 sm:$0xff] }
 0xb96   :  { %5292 = vmatprep.subr.mxu0 %v5727_v63 }
 0xc67   :  { %v3196_v28 = vpop.f32.mrb[36].mxu0 }
 0xc68   :  { %v5284_v29 = vpop.f32.mrb[37].mxu0  ;;  %5290 = vmatmul.mubr.msk.f32.vlgmr.msra.gmra.mrb[38].mxu0 %vm858_vm2, %v3196_v28 }
 0xc69   :  { %5293 = vmatpush3.msk.msra.mxu0 %vm3126_vm5, %v3119_v23  ;;  %5294 = vmatprep.mubr.msk.f32.mxu0 %vm5726_vm3, %v5727_v63 }
 0xc6a   :  { %5631 = vmatprep.subr.bf16.mxu0 %v5725_v62 }
 0xc6c   :  { %5295 = vmatmul.mubr.msk.f32.vlgmr.msra.gmra.mrb[40].mxu0 %vm3122_vm6, %v4592_v30 }
 0xc6d   :  { %5633 = vmatpush3.bf16.msra.mxu0 %v5632_v31  ;;  %5301 = vmatprep.mubr.msk.f32.mxu0 %vm5726_vm3, %v5727_v63 }
 0xc6e   :  { %5304 = vmatprep.subr.mxu0 %v5727_v63 }
 0xd3f   :  { %v3353_v34 = vpop.f32.mrb[40].mxu0 }
 0xd40   :  { %v5296_v35 = vpop.f32.mrb[41].mxu0  ;;  %5302 = vmatmul.mubr.msk.f32.vlgmr.msra.gmra.mrb[38].mxu0 %vm858_vm2, %v3353_v34 }
 0xd41   :  { %5305 = vmatpush3.msk.msra.mxu0 %vm3126_vm5, %v3119_v23  ;;  %5306 = vmatprep.mubr.msk.f32.mxu0 %vm5726_vm3, %v5727_v63 }
 0xd42   :  { %5634 = vmatprep.subr.bf16.mxu0 %v5725_v62 }
 0xd44   :  { %5307 = vmatmul.mubr.msk.f32.vlgmr.msra.gmra.mrb[42].mxu0 %vm3122_vm6, %v4598_v36 }
 0xd45   :  { %5636 = vmatpush3.bf16.msra.mxu0 %v5635_v37  ;;  %5313 = vmatprep.mubr.msk.f32.mxu0 %vm5726_vm3, %v5727_v63 }
 0xd46   :  { %5328 = vmatprep.subr.mxu0 %v5727_v63 }
 0xe17   :  { %v3505_v38 = vpop.f32.mrb[42].mxu0 }
 0xe18   :  { %v5308_v39 = vpop.f32.mrb[43].mxu0  ;;  %5314 = vmatmul.mubr.msk.f32.vlgmr.msra.gmra.mrb[38].mxu0 %vm858_vm2, %v3505_v38 }
 0xe19   :  { %5330 = vmatprep.mubr.msk.f32.mxu0 %vm5726_vm3, %v5727_v63 }
 0xeeb   :  { %v3581_v41 = vpop.f32.mrb[38].mxu0 }
 0xeec   :  { %v5650_v42 = vadd.f32 %v4591_v40, %v3581_v41  ;;  %v5315_v43 = vpop.f32.mrb[39].mxu0 }
 0xeee   :  { %v3586_v46 = vmax.f32 %v5650_v42, 0.0 }
 0xef0   :  { %5317 = vmatpush3.msk.msra.mxu1 %vm3126_vm5, %v3586_v46  ;;  %5329 = vmatpush3.msk.msra.mxu0 %vm3126_vm5, %v3586_v46 }
 0xef1   :  { %5319 = vmatmul.mubr.msk.f32.vlgmr.msra.gmra.mrb[10].mxu1 %vm3122_vm6, %v3588_v47  ;;  %5331 = vmatmul.mubr.msk.f32.vlgmr.msra.gmra.mrb[44].mxu0 %vm3122_vm6, %v4608_v48 }
 0xef2   :  { %5637 = vmatprep.subr.bf16.mxu1 %v5725_v62  ;;  %5325 = vmatprep.mubr.msk.f32.mxu1 %vm5726_vm3, %v5727_v63 }
 0xef3   :  { %5639 = vmatpush3.bf16.msra.mxu1 %v5638_v49  ;;  %5340 = vmatprep.subr.mxu0 %v5727_v63 }
 0xef4   :  { %5640 = vmatprep.subr.bf16.mxu1 %v5725_v62  ;;  %5342 = vmatprep.mubr.msk.f32.mxu0 %vm5726_vm3, %v5727_v63  ;;  %v3980_v62 = vld [vmem:[%s4420_s29] sm:$0xff] }
 0xfc4   :  { %v3661_v53 = vpop.f32.mrb[10].mxu1  ;;  %v3818_v54 = vpop.f32.mrb[44].mxu0 }
 0xfc5   :  { %v5320_v55 = vpop.f32.mrb[11].mxu1  ;;  %5326 = vmatmul.mubr.msk.f32.vlgmr.msra.gmra.mrb[12].mxu1 %vm858_vm2, %v3661_v53  ;;  %v5332_v56 = vpop.f32.mrb[45].mxu0 }
 0xfc6   :  { %5642 = vmatpush3.bf16.msra.mxu1 %v5641_v52  ;;  %5337 = vmatprep.mubr.msk.f32.mxu1 %vm5726_vm3, %v5727_v63 }
 0xfc7   :  { %5345 = vmatprep.subr.mxu1 %v5727_v63 }
 0xfcd   :  { %5338 = vmatmul.mubr.msk.f32.vlgmr.msra.gmra.mrb[12].mxu1 %vm858_vm2, %v3818_v54 }
 0xfce   :  { %5347 = vmatprep.mubr.msk.f32.mxu1 %vm5726_vm3, %v5727_v63  ;;  %5346 = vmatpush3.msra.mxu1 %v3980_v62 }
 0xfcf   :  { %5355 = vmatprep.subr.mxu1 %v5727_v63 }
0x10a0   :  { %v3894_v58 = vpop.f32.mrb[12].mxu1 }
0x10a1   :  { %v5651_v59 = vadd.f32 %v4607_v57, %v3894_v58  ;;  %v5339_v60 = vpop.f32.mrb[13].mxu1 }
0x10a3   :  { %v3899_v61 = vmax.f32 %v5651_v59, 0.0 }
0x10a5   :  { %5341 = vmatpush3.msk.msra.mxu0 %vm3906_vm7, %v3899_v61 }
0x10a6   :  { %5343 = vmatmul.mubr.msk.f32.vlgmr.msra.gmra.mrb[46].mxu0 %vm3902_vm8, %v3901_v0  ;;  %5350 = vmatprep.subr.mxu0 %v5727_v63 }
0x10a7   :  { %5352 = vmatprep.mubr.msk.f32.mxu0 %vm5726_vm3, %v5727_v63  ;;  %5351 = vmatpush3.msra.mxu0 %v4063_v3 }
0x10a8   :  { %5360 = vmatprep.subr.mxu0 %v5727_v63 }
0x1179   :  { %v3976_v1 = vpop.f32.mrb[46].mxu0 }
0x117a   :  { %v5344_v2 = vpop.f32.mrb[47].mxu0  ;;  %5348 = vmatmul.mubr.msk.f32.vlgmr.msra.gmra.mrb[14].mxu1 %vm2031_vm4, %v3976_v1 }
0x117b   :  { %5357 = vmatprep.mubr.msk.f32.mxu1 %vm5726_vm3, %v5727_v63  ;;  %5356 = vmatpush3.msra.mxu1 %v4146_v9 }
0x117c   :  { %5365 = vmatprep.subr.mxu1 %v5727_v63 }
0x124d   :  { %v4050_v5 = vpop.f32.mrb[14].mxu1 }
0x124e   :  { %v4060_v6 = vadd.f32 %v4617_v4, %v4050_v5  ;;  %v5349_v7 = vpop.f32.mrb[15].mxu1 }
0x1250   :  { %v4061_v8 = vmax.f32 %v4060_v6, 0.0 }
0x1252   :  { %5353 = vmatmul.mubr.msk.f32.vlgmr.msra.gmra.mrb[48].mxu0 %vm2031_vm4, %v4061_v8 }
0x1253   :  { %5362 = vmatprep.mubr.msk.f32.mxu0 %vm5726_vm3, %v5727_v63  ;;  %5361 = vmatpush3.msra.mxu0 %v4229_v15 }
0x1325   :  { %v4133_v11 = vpop.f32.mrb[48].mxu0 }
0x1326   :  { %v4143_v12 = vadd.f32 %v4619_v10, %v4133_v11  ;;  %v5354_v13 = vpop.f32.mrb[49].mxu0 }
0x1328   :  { %v4144_v14 = vmax.f32 %v4143_v12, 0.0 }
0x132a   :  { %5358 = vmatmul.mubr.msk.f32.vlgmr.msra.gmra.mrb[16].mxu1 %vm2031_vm4, %v4144_v14 }
0x132b   :  { %5367 = vmatprep.mubr.msk.f32.mxu1 %vm5726_vm3, %v5727_v63  ;;  %v4311_v63 = vld [vmem:[%s4428_s5] sm:$0xff] }
0x132c   :  { %5366 = vmatpush3.msra.mxu1 %v4311_v63 }
0x13fd   :  { %v4216_v17 = vpop.f32.mrb[16].mxu1 }
0x13fe   :  { %v4226_v18 = vadd.f32 %v4621_v16, %v4216_v17  ;;  %v5359_v19 = vpop.f32.mrb[17].mxu1 }
0x1400   :  { %v4227_v20 = vmax.f32 %v4226_v18, 0.0 }
0x1402   :  { %5363 = vmatmul.mubr.msk.f32.vlgmr.msra.gmra.mrb[50].mxu0 %vm2031_vm4, %v4227_v20 }
0x14d5   :  { %v4299_v22 = vpop.f32.mrb[50].mxu0 }
0x14d6   :  { %v4309_v23 = vadd.f32 %v4623_v21, %v4299_v22  ;;  %v5364_v24 = vpop.f32.mrb[51].mxu0 }
0x14d8   :  { %5368 = vmatmul.mubr.msk.f32.vlgmr.msra.gmra.mrb[18].mxu1 %vm2031_vm4, %v4309_v23 }
0x15ab   :  { %v4381_v26 = vpop.f32.mrb[18].mxu1 }
0x15ac   :  { %v4391_v27 = vadd.f32 %v4625_v25, %v4381_v26  ;;  %v5369_v28 = vpop.f32.mrb[19].mxu1 }
0x15ae   :  { %4393 = vst.msk [vmem:[%s4430_s17] sm:$0x3] %vm4392_vm9, %v4391_v27 }

</bundles_post_ra>
